<compile_context>
chip_gen: v6e
topology: v6e:2x2x1
jax: 0.10.0
libtpu: 0.0.40
codegen_flags: <defaults>
</compile_context>

<pallas_src>
import functools
import math

import jax
import jax.numpy as jnp
from jax.experimental import pallas as pl
from jax.experimental.pallas import tpu as pltpu


def _conv_relu_kernel(x_ref, t_ref, b_ref, o_ref, acc_ref, *, K, TH, compute_dtype):
    """One (image, output-row-tile) grid step.

    x_ref:   (1, H, W*C)       full image rows (resident across row tiles)
    t_ref:   (K, W*C, OW*OC)   Toeplitz-expanded weights (resident)
    b_ref:   (1, OW*OC)        bias broadcast over ow
    o_ref:   (1, TH, OW*OC)    output row tile (lane-dense last dim)
    acc_ref: (TH, OW*OC) f32   VMEM accumulator scratch
    """
    r = pl.program_id(1)
    row0 = pl.multiple_of(r * TH, TH)

    acc_ref[...] = jnp.zeros_like(acc_ref)

    # Hot loop: K statically-unrolled MXU matmuls.  Input slices are
    # sublane-only (dynamic start on the H axis, full lane width), so this
    # replaces the old 81-way slice + concatenate im2col entirely.
    for dy in range(K):
        x_rows = x_ref[0, pl.ds(row0 + dy, TH), :].astype(compute_dtype)  # (TH, W*C)
        acc_ref[...] += jnp.dot(x_rows, t_ref[dy],
                                preferred_element_type=jnp.float32)

    # f32 epilogue (bias + ReLU), full-lane store.
    out = jnp.maximum(acc_ref[...] + b_ref[...], 0.0)
    o_ref[0] = out.astype(o_ref.dtype)


def _toeplitz_weights(weight_oihw, K, C, W, OW, OC, dtype):
    """T[dy, w*C + c, ow*OC + oc] = weight[oc, c, dy, w - ow] (0 if w-ow not in [0, K))."""
    j = jnp.arange(W * C)
    iw, ic = j // C, j % C                                   # (W*C,)
    dx = iw[:, None] - jnp.arange(OW)[None, :]               # (W*C, OW)
    valid = (dx >= 0) & (dx < K)
    dx_c = jnp.clip(dx, 0, K - 1)
    w_t = jnp.transpose(weight_oihw, (2, 3, 1, 0)).astype(jnp.float32)  # (K, K, C, OC)
    t = w_t[:, dx_c, ic[:, None], :]                          # (K, W*C, OW, OC)
    t = jnp.where(valid[None, :, :, None], t, 0.0)
    return t.reshape(K, W * C, OW * OC).astype(dtype)


def _pick_row_tile(oh, ow, oc, budget_bytes=8 << 20):
    """Output rows per grid step.

    Bounds the f32 row tile (TH, OW*OC) to ~budget_bytes, keeps OH % TH == 0,
    and keeps TH a multiple of 8 (or equal to OH) to satisfy (8, 128) tiling.
    """
    max_rows = max(1, budget_bytes // max(1, ow * oc * 4))
    if oh <= max_rows:
        return oh
    for t in range(min(oh, max_rows), 0, -1):
        if oh % t == 0 and t % 8 == 0:
            return t
    return oh


def conv_layer_forward(x_nchw, weight_oihw, bias, *, stride=1, padding=0,
                       mxu_dtype=jnp.float32, nhwc_output=False):
    """Pallas equivalent of ConvLayer.forward: relu(conv2d(x)).  NCHW in/out."""
    assert stride == 1 and padding == 0, "ConvLayer defaults: stride=1, padding=0"
    N, C, H, W = x_nchw.shape
    OC, C_w, K, K2 = weight_oihw.shape
    assert C == C_w and K == K2
    OH, OW = H - K + 1, W - K + 1

    # Pad OC so the stored lane dim OW*OC_pad is a multiple of 128 (full-lane
    # stores).  Padded channels are zero (relu(0+0)=0) and sliced off below.
    lane = 128 // math.gcd(OW, 128)
    OC_pad = -(-OC // lane) * lane
    if OC_pad != OC:
        weight_oihw = jnp.pad(weight_oihw, ((0, OC_pad - OC), (0, 0), (0, 0), (0, 0)))
        bias = jnp.pad(bias, (0, OC_pad - OC))

    WC = W * C
    OWOC = OW * OC_pad

    # Layout plumbing (small tensors; for C == 1 the input transpose is a free
    # reshape).  Lane axis of the kernel input carries W*C.
    x_rows = jnp.transpose(x_nchw, (0, 2, 3, 1)).reshape(N, H, WC)
    t = _toeplitz_weights(weight_oihw, K, C, W, OW, OC_pad, mxu_dtype)
    b_row = jnp.tile(bias.astype(jnp.float32), OW).reshape(1, OWOC)

    TH = _pick_row_tile(OH, OW, OC_pad)
    grid = (N, OH // TH)

    kernel = functools.partial(_conv_relu_kernel, K=K, TH=TH, compute_dtype=mxu_dtype)

    out = pl.pallas_call(
        kernel,
        out_shape=jax.ShapeDtypeStruct((N, OH, OWOC), x_nchw.dtype),
        grid_spec=pltpu.PrefetchScalarGridSpec(
            num_scalar_prefetch=0,
            grid=grid,
            in_specs=[
                pl.BlockSpec((1, H, WC), lambda n, r: (n, 0, 0)),      # image rows (incl. halo)
                pl.BlockSpec((K, WC, OWOC), lambda n, r: (0, 0, 0)),   # weights, resident
                pl.BlockSpec((1, OWOC), lambda n, r: (0, 0)),          # bias, resident
            ],
            out_specs=pl.BlockSpec((1, TH, OWOC), lambda n, r: (n, r, 0)),
            scratch_shapes=[pltpu.VMEM((TH, OWOC), jnp.float32)],
        ),
        compiler_params=pltpu.CompilerParams(
            dimension_semantics=("parallel", "parallel"),
            vmem_limit_bytes=32 << 20,   # comfortably inside v7x's 64 MiB physical VMEM
        ),
    )(x_rows, t, b_row)

    y = out.reshape(N, OH, OW, OC_pad)[..., :OC]   # reshape is layout-free; slice drops padding
    if nhwc_output:
        return y
    # NCHW to match nn.Conv2d semantics; this is one XLA relayout of the
    # output — pass nhwc_output=True to skip it if the consumer allows NHWC.
    return jnp.transpose(y, (0, 3, 1, 2))


def _reference(x_nchw, weight_oihw, bias):
    y = jax.lax.conv_general_dilated(
        x_nchw.astype(jnp.float32), weight_oihw.astype(jnp.float32),
        window_strides=(1, 1), padding="VALID",
        dimension_numbers=("NCHW", "OIHW", "NCHW"))
    y = y + bias.astype(jnp.float32)[None, :, None, None]
    return jnp.maximum(y, 0.0)


if __name__ == "__main__":
    key = jax.random.PRNGKey(0)
    configs = [
        # Module defaults (in_channels=1, out_channels=256, kernel_size=9) at small spatial size.
        dict(N=2, C=1, H=16, W=16, OC=256, K=9),
        # General-C path (C folded into the lane axis).
        dict(N=2, C=4, H=16, W=16, OC=64, K=9),
    ]

    for cfg in configs:
        N, C, H, W, OC, K = (cfg[k] for k in ("N", "C", "H", "W", "OC", "K"))
        key, kx, kw, kb = jax.random.split(key, 4)

        x = jax.random.normal(kx, (N, C, H, W), dtype=jnp.float32)
        fan_in = C * K * K
        bound = 1.0 / (fan_in ** 0.5)
        weight = jax.random.uniform(kw, (OC, C, K, K), jnp.float32, -bound, bound)
        bias = jax.random.uniform(kb, (OC,), jnp.float32, -bound, bound)

        out = jax.block_until_ready(conv_layer_forward(x, weight, bias))
        ref = _reference(x, weight, bias)

        assert out.shape == (N, OC, H - K + 1, W - K + 1)
        assert jnp.allclose(out, ref, atol=2e-4, rtol=2e-4), float(jnp.max(jnp.abs(out - ref)))

    print("KERNEL_OK")
</pallas_src>

<mosaic_0001>
module attributes {stable_mosaic.version = 11 : i64} {
  func.func @_conv_relu_kernel(%arg0: i32, %arg1: i32, %arg2: memref<1x16x16xf32, #tpu.memory_space<vmem>>, %arg3: memref<9x16x2048xf32, #tpu.memory_space<vmem>>, %arg4: memref<1x2048xf32, #tpu.memory_space<vmem>>, %arg5: memref<1x8x2048xf32, #tpu.memory_space<vmem>>, %arg6: memref<8x2048xf32, #tpu.memory_space<vmem>>) attributes {dimension_semantics = [#tpu.dimension_semantics<parallel>, #tpu.dimension_semantics<parallel>], iteration_bounds = array<i64: 2, 1>, scalar_prefetch = 0 : i64, scratch_operands = 1 : i64, tpu.core_type = #tpu.core_type<tc>, window_params = [{transform_indices = @transform_0, window_bounds = array<i64: 1, 16, 16>}, {pipeline_mode = #tpu.pipeline_mode<synchronous>, transform_indices = @transform_1, window_bounds = array<i64: 9, 16, 2048>}, {pipeline_mode = #tpu.pipeline_mode<synchronous>, transform_indices = @transform_2, window_bounds = array<i64: 1, 2048>}, {transform_indices = @transform_3, window_bounds = array<i64: 1, 8, 2048>}]} {
    %c8_i32 = arith.constant 8 : i32
    %0 = arith.muli %arg1, %c8_i32 : i32
    %1 = tpu.assume_multiple %0, 8 : i32
    %cst = arith.constant 0.000000e+00 : f32
    %2 = vector.broadcast %cst : f32 to vector<8x2048xf32>
    %c0 = arith.constant 0 : index
    %c0_0 = arith.constant 0 : index
    %3 = vector.load %arg6[%c0, %c0_0] : memref<8x2048xf32, #tpu.memory_space<vmem>>, vector<8x2048xf32>
    tpu.vector_store %arg6[%c0, %c0_0], %2 {strides = array<i32>} : memref<8x2048xf32, #tpu.memory_space<vmem>>, vector<8x2048xf32>,
    %c0_i32 = arith.constant 0 : i32
    %4 = arith.addi %1, %c0_i32 : i32
    %c0_1 = arith.constant 0 : index
    %5 = arith.index_cast %4 : i32 to index
    %c0_2 = arith.constant 0 : index
    %6 = vector.load %arg2[%c0_1, %5, %c0_2] : memref<1x16x16xf32, #tpu.memory_space<vmem>>, vector<1x8x16xf32>
    %7 = vector.shape_cast %6 : vector<1x8x16xf32> to vector<8x16xf32>
    %c0_3 = arith.constant 0 : index
    %c0_4 = arith.constant 0 : index
    %8 = vector.load %arg6[%c0_3, %c0_4] : memref<8x2048xf32, #tpu.memory_space<vmem>>, vector<8x2048xf32>
    %c0_5 = arith.constant 0 : index
    %c0_6 = arith.constant 0 : index
    %c0_7 = arith.constant 0 : index
    %9 = vector.load %arg3[%c0_5, %c0_6, %c0_7] : memref<9x16x2048xf32, #tpu.memory_space<vmem>>, vector<1x16x2048xf32>
    %10 = vector.shape_cast %9 : vector<1x16x2048xf32> to vector<16x2048xf32>
    %cst_8 = arith.constant dense<0.000000e+00> : vector<8x2048xf32>
    %11 = tpu.matmul %7, %10, %cst_8 {dimension_numbers = #tpu.dot_dimension_numbers<[1], [0], [0], [1], [0, 0, 1, 1], [], []>} : vector<8x16xf32>, vector<16x2048xf32>, vector<8x2048xf32> -> vector<8x2048xf32>
    %12 = arith.addf %8, %11 : vector<8x2048xf32>
    %c0_9 = arith.constant 0 : index
    %c0_10 = arith.constant 0 : index
    %13 = vector.load %arg6[%c0_9, %c0_10] : memref<8x2048xf32, #tpu.memory_space<vmem>>, vector<8x2048xf32>
    tpu.vector_store %arg6[%c0_9, %c0_10], %12 {strides = array<i32>} : memref<8x2048xf32, #tpu.memory_space<vmem>>, vector<8x2048xf32>,
    %c1_i32 = arith.constant 1 : i32
    %14 = arith.addi %1, %c1_i32 : i32
    %c0_11 = arith.constant 0 : index
    %15 = arith.index_cast %14 : i32 to index
    %c0_12 = arith.constant 0 : index
    %16 = vector.load %arg2[%c0_11, %15, %c0_12] : memref<1x16x16xf32, #tpu.memory_space<vmem>>, vector<1x8x16xf32>
    %17 = vector.shape_cast %16 : vector<1x8x16xf32> to vector<8x16xf32>
    %c0_13 = arith.constant 0 : index
    %c0_14 = arith.constant 0 : index
    %18 = vector.load %arg6[%c0_13, %c0_14] : memref<8x2048xf32, #tpu.memory_space<vmem>>, vector<8x2048xf32>
    %c1 = arith.constant 1 : index
    %c0_15 = arith.constant 0 : index
    %c0_16 = arith.constant 0 : index
    %19 = vector.load %arg3[%c1, %c0_15, %c0_16] : memref<9x16x2048xf32, #tpu.memory_space<vmem>>, vector<1x16x2048xf32>
    %20 = vector.shape_cast %19 : vector<1x16x2048xf32> to vector<16x2048xf32>
    %cst_17 = arith.constant dense<0.000000e+00> : vector<8x2048xf32>
    %21 = tpu.matmul %17, %20, %cst_17 {dimension_numbers = #tpu.dot_dimension_numbers<[1], [0], [0], [1], [0, 0, 1, 1], [], []>} : vector<8x16xf32>, vector<16x2048xf32>, vector<8x2048xf32> -> vector<8x2048xf32>
    %22 = arith.addf %18, %21 : vector<8x2048xf32>
    %c0_18 = arith.constant 0 : index
    %c0_19 = arith.constant 0 : index
    %23 = vector.load %arg6[%c0_18, %c0_19] : memref<8x2048xf32, #tpu.memory_space<vmem>>, vector<8x2048xf32>
    tpu.vector_store %arg6[%c0_18, %c0_19], %22 {strides = array<i32>} : memref<8x2048xf32, #tpu.memory_space<vmem>>, vector<8x2048xf32>,
    %c2_i32 = arith.constant 2 : i32
    %24 = arith.addi %1, %c2_i32 : i32
    %c0_20 = arith.constant 0 : index
    %25 = arith.index_cast %24 : i32 to index
    %c0_21 = arith.constant 0 : index
    %26 = vector.load %arg2[%c0_20, %25, %c0_21] : memref<1x16x16xf32, #tpu.memory_space<vmem>>, vector<1x8x16xf32>
    %27 = vector.shape_cast %26 : vector<1x8x16xf32> to vector<8x16xf32>
    %c0_22 = arith.constant 0 : index
    %c0_23 = arith.constant 0 : index
    %28 = vector.load %arg6[%c0_22, %c0_23] : memref<8x2048xf32, #tpu.memory_space<vmem>>, vector<8x2048xf32>
    %c2 = arith.constant 2 : index
    %c0_24 = arith.constant 0 : index
    %c0_25 = arith.constant 0 : index
    %29 = vector.load %arg3[%c2, %c0_24, %c0_25] : memref<9x16x2048xf32, #tpu.memory_space<vmem>>, vector<1x16x2048xf32>
    %30 = vector.shape_cast %29 : vector<1x16x2048xf32> to vector<16x2048xf32>
    %cst_26 = arith.constant dense<0.000000e+00> : vector<8x2048xf32>
    %31 = tpu.matmul %27, %30, %cst_26 {dimension_numbers = #tpu.dot_dimension_numbers<[1], [0], [0], [1], [0, 0, 1, 1], [], []>} : vector<8x16xf32>, vector<16x2048xf32>, vector<8x2048xf32> -> vector<8x2048xf32>
    %32 = arith.addf %28, %31 : vector<8x2048xf32>
    %c0_27 = arith.constant 0 : index
    %c0_28 = arith.constant 0 : index
    %33 = vector.load %arg6[%c0_27, %c0_28] : memref<8x2048xf32, #tpu.memory_space<vmem>>, vector<8x2048xf32>
    tpu.vector_store %arg6[%c0_27, %c0_28], %32 {strides = array<i32>} : memref<8x2048xf32, #tpu.memory_space<vmem>>, vector<8x2048xf32>,
    %c3_i32 = arith.constant 3 : i32
    %34 = arith.addi %1, %c3_i32 : i32
    %c0_29 = arith.constant 0 : index
    %35 = arith.index_cast %34 : i32 to index
    %c0_30 = arith.constant 0 : index
    %36 = vector.load %arg2[%c0_29, %35, %c0_30] : memref<1x16x16xf32, #tpu.memory_space<vmem>>, vector<1x8x16xf32>
    %37 = vector.shape_cast %36 : vector<1x8x16xf32> to vector<8x16xf32>
    %c0_31 = arith.constant 0 : index
    %c0_32 = arith.constant 0 : index
    %38 = vector.load %arg6[%c0_31, %c0_32] : memref<8x2048xf32, #tpu.memory_space<vmem>>, vector<8x2048xf32>
    %c3 = arith.constant 3 : index
    %c0_33 = arith.constant 0 : index
    %c0_34 = arith.constant 0 : index
    %39 = vector.load %arg3[%c3, %c0_33, %c0_34] : memref<9x16x2048xf32, #tpu.memory_space<vmem>>, vector<1x16x2048xf32>
    %40 = vector.shape_cast %39 : vector<1x16x2048xf32> to vector<16x2048xf32>
    %cst_35 = arith.constant dense<0.000000e+00> : vector<8x2048xf32>
    %41 = tpu.matmul %37, %40, %cst_35 {dimension_numbers = #tpu.dot_dimension_numbers<[1], [0], [0], [1], [0, 0, 1, 1], [], []>} : vector<8x16xf32>, vector<16x2048xf32>, vector<8x2048xf32> -> vector<8x2048xf32>
    %42 = arith.addf %38, %41 : vector<8x2048xf32>
    %c0_36 = arith.constant 0 : index
    %c0_37 = arith.constant 0 : index
    %43 = vector.load %arg6[%c0_36, %c0_37] : memref<8x2048xf32, #tpu.memory_space<vmem>>, vector<8x2048xf32>
    tpu.vector_store %arg6[%c0_36, %c0_37], %42 {strides = array<i32>} : memref<8x2048xf32, #tpu.memory_space<vmem>>, vector<8x2048xf32>,
    %c4_i32 = arith.constant 4 : i32
    %44 = arith.addi %1, %c4_i32 : i32
    %c0_38 = arith.constant 0 : index
    %45 = arith.index_cast %44 : i32 to index
    %c0_39 = arith.constant 0 : index
    %46 = vector.load %arg2[%c0_38, %45, %c0_39] : memref<1x16x16xf32, #tpu.memory_space<vmem>>, vector<1x8x16xf32>
    %47 = vector.shape_cast %46 : vector<1x8x16xf32> to vector<8x16xf32>
    %c0_40 = arith.constant 0 : index
    %c0_41 = arith.constant 0 : index
    %48 = vector.load %arg6[%c0_40, %c0_41] : memref<8x2048xf32, #tpu.memory_space<vmem>>, vector<8x2048xf32>
    %c4 = arith.constant 4 : index
    %c0_42 = arith.constant 0 : index
    %c0_43 = arith.constant 0 : index
    %49 = vector.load %arg3[%c4, %c0_42, %c0_43] : memref<9x16x2048xf32, #tpu.memory_space<vmem>>, vector<1x16x2048xf32>
    %50 = vector.shape_cast %49 : vector<1x16x2048xf32> to vector<16x2048xf32>
    %cst_44 = arith.constant dense<0.000000e+00> : vector<8x2048xf32>
    %51 = tpu.matmul %47, %50, %cst_44 {dimension_numbers = #tpu.dot_dimension_numbers<[1], [0], [0], [1], [0, 0, 1, 1], [], []>} : vector<8x16xf32>, vector<16x2048xf32>, vector<8x2048xf32> -> vector<8x2048xf32>
    %52 = arith.addf %48, %51 : vector<8x2048xf32>
    %c0_45 = arith.constant 0 : index
    %c0_46 = arith.constant 0 : index
    %53 = vector.load %arg6[%c0_45, %c0_46] : memref<8x2048xf32, #tpu.memory_space<vmem>>, vector<8x2048xf32>
    tpu.vector_store %arg6[%c0_45, %c0_46], %52 {strides = array<i32>} : memref<8x2048xf32, #tpu.memory_space<vmem>>, vector<8x2048xf32>,
    %c5_i32 = arith.constant 5 : i32
    %54 = arith.addi %1, %c5_i32 : i32
    %c0_47 = arith.constant 0 : index
    %55 = arith.index_cast %54 : i32 to index
    %c0_48 = arith.constant 0 : index
    %56 = vector.load %arg2[%c0_47, %55, %c0_48] : memref<1x16x16xf32, #tpu.memory_space<vmem>>, vector<1x8x16xf32>
    %57 = vector.shape_cast %56 : vector<1x8x16xf32> to vector<8x16xf32>
    %c0_49 = arith.constant 0 : index
    %c0_50 = arith.constant 0 : index
    %58 = vector.load %arg6[%c0_49, %c0_50] : memref<8x2048xf32, #tpu.memory_space<vmem>>, vector<8x2048xf32>
    %c5 = arith.constant 5 : index
    %c0_51 = arith.constant 0 : index
    %c0_52 = arith.constant 0 : index
    %59 = vector.load %arg3[%c5, %c0_51, %c0_52] : memref<9x16x2048xf32, #tpu.memory_space<vmem>>, vector<1x16x2048xf32>
    %60 = vector.shape_cast %59 : vector<1x16x2048xf32> to vector<16x2048xf32>
    %cst_53 = arith.constant dense<0.000000e+00> : vector<8x2048xf32>
    %61 = tpu.matmul %57, %60, %cst_53 {dimension_numbers = #tpu.dot_dimension_numbers<[1], [0], [0], [1], [0, 0, 1, 1], [], []>} : vector<8x16xf32>, vector<16x2048xf32>, vector<8x2048xf32> -> vector<8x2048xf32>
    %62 = arith.addf %58, %61 : vector<8x2048xf32>
    %c0_54 = arith.constant 0 : index
    %c0_55 = arith.constant 0 : index
    %63 = vector.load %arg6[%c0_54, %c0_55] : memref<8x2048xf32, #tpu.memory_space<vmem>>, vector<8x2048xf32>
    tpu.vector_store %arg6[%c0_54, %c0_55], %62 {strides = array<i32>} : memref<8x2048xf32, #tpu.memory_space<vmem>>, vector<8x2048xf32>,
    %c6_i32 = arith.constant 6 : i32
    %64 = arith.addi %1, %c6_i32 : i32
    %c0_56 = arith.constant 0 : index
    %65 = arith.index_cast %64 : i32 to index
    %c0_57 = arith.constant 0 : index
    %66 = vector.load %arg2[%c0_56, %65, %c0_57] : memref<1x16x16xf32, #tpu.memory_space<vmem>>, vector<1x8x16xf32>
    %67 = vector.shape_cast %66 : vector<1x8x16xf32> to vector<8x16xf32>
    %c0_58 = arith.constant 0 : index
    %c0_59 = arith.constant 0 : index
    %68 = vector.load %arg6[%c0_58, %c0_59] : memref<8x2048xf32, #tpu.memory_space<vmem>>, vector<8x2048xf32>
    %c6 = arith.constant 6 : index
    %c0_60 = arith.constant 0 : index
    %c0_61 = arith.constant 0 : index
    %69 = vector.load %arg3[%c6, %c0_60, %c0_61] : memref<9x16x2048xf32, #tpu.memory_space<vmem>>, vector<1x16x2048xf32>
    %70 = vector.shape_cast %69 : vector<1x16x2048xf32> to vector<16x2048xf32>
    %cst_62 = arith.constant dense<0.000000e+00> : vector<8x2048xf32>
    %71 = tpu.matmul %67, %70, %cst_62 {dimension_numbers = #tpu.dot_dimension_numbers<[1], [0], [0], [1], [0, 0, 1, 1], [], []>} : vector<8x16xf32>, vector<16x2048xf32>, vector<8x2048xf32> -> vector<8x2048xf32>
    %72 = arith.addf %68, %71 : vector<8x2048xf32>
    %c0_63 = arith.constant 0 : index
    %c0_64 = arith.constant 0 : index
    %73 = vector.load %arg6[%c0_63, %c0_64] : memref<8x2048xf32, #tpu.memory_space<vmem>>, vector<8x2048xf32>
    tpu.vector_store %arg6[%c0_63, %c0_64], %72 {strides = array<i32>} : memref<8x2048xf32, #tpu.memory_space<vmem>>, vector<8x2048xf32>,
    %c7_i32 = arith.constant 7 : i32
    %74 = arith.addi %1, %c7_i32 : i32
    %c0_65 = arith.constant 0 : index
    %75 = arith.index_cast %74 : i32 to index
    %c0_66 = arith.constant 0 : index
    %76 = vector.load %arg2[%c0_65, %75, %c0_66] : memref<1x16x16xf32, #tpu.memory_space<vmem>>, vector<1x8x16xf32>
    %77 = vector.shape_cast %76 : vector<1x8x16xf32> to vector<8x16xf32>
    %c0_67 = arith.constant 0 : index
    %c0_68 = arith.constant 0 : index
    %78 = vector.load %arg6[%c0_67, %c0_68] : memref<8x2048xf32, #tpu.memory_space<vmem>>, vector<8x2048xf32>
    %c7 = arith.constant 7 : index
    %c0_69 = arith.constant 0 : index
    %c0_70 = arith.constant 0 : index
    %79 = vector.load %arg3[%c7, %c0_69, %c0_70] : memref<9x16x2048xf32, #tpu.memory_space<vmem>>, vector<1x16x2048xf32>
    %80 = vector.shape_cast %79 : vector<1x16x2048xf32> to vector<16x2048xf32>
    %cst_71 = arith.constant dense<0.000000e+00> : vector<8x2048xf32>
    %81 = tpu.matmul %77, %80, %cst_71 {dimension_numbers = #tpu.dot_dimension_numbers<[1], [0], [0], [1], [0, 0, 1, 1], [], []>} : vector<8x16xf32>, vector<16x2048xf32>, vector<8x2048xf32> -> vector<8x2048xf32>
    %82 = arith.addf %78, %81 : vector<8x2048xf32>
    %c0_72 = arith.constant 0 : index
    %c0_73 = arith.constant 0 : index
    %83 = vector.load %arg6[%c0_72, %c0_73] : memref<8x2048xf32, #tpu.memory_space<vmem>>, vector<8x2048xf32>
    tpu.vector_store %arg6[%c0_72, %c0_73], %82 {strides = array<i32>} : memref<8x2048xf32, #tpu.memory_space<vmem>>, vector<8x2048xf32>,
    %c8_i32_74 = arith.constant 8 : i32
    %84 = arith.addi %1, %c8_i32_74 : i32
    %c0_75 = arith.constant 0 : index
    %85 = arith.index_cast %84 : i32 to index
    %c0_76 = arith.constant 0 : index
    %86 = vector.load %arg2[%c0_75, %85, %c0_76] : memref<1x16x16xf32, #tpu.memory_space<vmem>>, vector<1x8x16xf32>
    %87 = vector.shape_cast %86 : vector<1x8x16xf32> to vector<8x16xf32>
    %c0_77 = arith.constant 0 : index
    %c0_78 = arith.constant 0 : index
    %88 = vector.load %arg6[%c0_77, %c0_78] : memref<8x2048xf32, #tpu.memory_space<vmem>>, vector<8x2048xf32>
    %c8 = arith.constant 8 : index
    %c0_79 = arith.constant 0 : index
    %c0_80 = arith.constant 0 : index
    %89 = vector.load %arg3[%c8, %c0_79, %c0_80] : memref<9x16x2048xf32, #tpu.memory_space<vmem>>, vector<1x16x2048xf32>
    %90 = vector.shape_cast %89 : vector<1x16x2048xf32> to vector<16x2048xf32>
    %cst_81 = arith.constant dense<0.000000e+00> : vector<8x2048xf32>
    %91 = tpu.matmul %87, %90, %cst_81 {dimension_numbers = #tpu.dot_dimension_numbers<[1], [0], [0], [1], [0, 0, 1, 1], [], []>} : vector<8x16xf32>, vector<16x2048xf32>, vector<8x2048xf32> -> vector<8x2048xf32>
    %92 = arith.addf %88, %91 : vector<8x2048xf32>
    %c0_82 = arith.constant 0 : index
    %c0_83 = arith.constant 0 : index
    %93 = vector.load %arg6[%c0_82, %c0_83] : memref<8x2048xf32, #tpu.memory_space<vmem>>, vector<8x2048xf32>
    tpu.vector_store %arg6[%c0_82, %c0_83], %92 {strides = array<i32>} : memref<8x2048xf32, #tpu.memory_space<vmem>>, vector<8x2048xf32>,
    %c0_84 = arith.constant 0 : index
    %c0_85 = arith.constant 0 : index
    %94 = vector.load %arg6[%c0_84, %c0_85] : memref<8x2048xf32, #tpu.memory_space<vmem>>, vector<8x2048xf32>
    %c0_86 = arith.constant 0 : index
    %c0_87 = arith.constant 0 : index
    %95 = vector.load %arg4[%c0_86, %c0_87] : memref<1x2048xf32, #tpu.memory_space<vmem>>, vector<1x2048xf32>
    %96 = vector.broadcast %95 : vector<1x2048xf32> to vector<8x2048xf32>
    %97 = arith.addf %94, %96 : vector<8x2048xf32>
    %cst_88 = arith.constant 0.000000e+00 : f32
    %98 = vector.broadcast %cst_88 : f32 to vector<8x2048xf32>
    %99 = arith.maximumf %97, %98 : vector<8x2048xf32>
    %c0_89 = arith.constant 0 : index
    %c0_90 = arith.constant 0 : index
    %c0_91 = arith.constant 0 : index
    %100 = vector.load %arg5[%c0_89, %c0_90, %c0_91] : memref<1x8x2048xf32, #tpu.memory_space<vmem>>, vector<1x8x2048xf32>
    %101 = vector.shape_cast %100 : vector<1x8x2048xf32> to vector<8x2048xf32>
    %102 = vector.shape_cast %99 : vector<8x2048xf32> to vector<1x8x2048xf32>
    tpu.vector_store %arg5[%c0_89, %c0_90, %c0_91], %102 {strides = array<i32>} : memref<1x8x2048xf32, #tpu.memory_space<vmem>>, vector<1x8x2048xf32>,
    return
  }
  func.func @transform_0(%arg0: i32, %arg1: i32) -> (i32, i32, i32) {
    %c0_i32 = arith.constant 0 : i32
    %c0_i32_0 = arith.constant 0 : i32
    %c0_i32_1 = arith.constant 0 : i32
    return %arg0, %c0_i32, %c0_i32_0 : i32, i32, i32
  }
  func.func @transform_1(%arg0: i32, %arg1: i32) -> (i32, i32, i32) {
    %c0_i32 = arith.constant 0 : i32
    %c0_i32_0 = arith.constant 0 : i32
    %c0_i32_1 = arith.constant 0 : i32
    %c0_i32_2 = arith.constant 0 : i32
    return %c0_i32, %c0_i32_0, %c0_i32_1 : i32, i32, i32
  }
  func.func @transform_2(%arg0: i32, %arg1: i32) -> (i32, i32) {
    %c0_i32 = arith.constant 0 : i32
    %c0_i32_0 = arith.constant 0 : i32
    %c0_i32_1 = arith.constant 0 : i32
    return %c0_i32, %c0_i32_0 : i32, i32
  }
  func.func @transform_3(%arg0: i32, %arg1: i32) -> (i32, i32, i32) {
    %c0_i32 = arith.constant 0 : i32
    %c0_i32_0 = arith.constant 0 : i32
    return %arg0, %arg1, %c0_i32 : i32, i32, i32
  }
}

</mosaic_0001>

<bundles_post_ra>
// kernel: tpu_custom_call.1
= control target key start
LH: loop header
LB: loop body
LE: loop exit
PB: predicated region body
PF: predicated region fallthrough
CT: control target
= control target key end

     0   :  { %8 = vsyncpa [#allocation4], 0  ;;  %s7590_s0 = inlined_call_operand.hbm [shape: f32[2,16,16], index: 0, kind: input, shape index: {}]   ;;  %s7591_s1 = inlined_call_operand.hbm [shape: f32[9,16,2048], index: 1, kind: input, shape index: {}]   ;;  %s7592_s2 = inlined_call_operand.hbm [shape: f32[1,2048], index: 2, kind: input, shape index: {}]   ;;  %s7593_s3 = inlined_call_operand.hbm [shape: f32[2,8,2048], index: 3, kind: output, shape index: {}]  }
   0x1   :  { %10 = vsyncpa [#allocation4 + $0x1], 0 }
   0x2   :  { %11 = vsyncpa [#allocation7], 0 }
   0x3   :  { %12 = vsyncpa [#allocation5], 0 }
   0x4   :  { %14 = vsyncpa [#allocation5 + $0x1], 0  ;;  %s6814_s12 = smov 0   ;;  %s6816_s13 = smov 0  }
   0x5   :  { %s6818_s14 = smov 0   ;;  %s6820_s15 = smov 0  }
   0x6   :  { %s6822_s16 = smov 0   ;;  %s6824_s17 = smov 0  }
   0x7 LB: > { %s6432_s18 = sadd.s32 4294967295, %s6784_s17   ;;  %s6433_s19 = sadd.s32 4294967294, %s6784_s17   ;;  %s6784_s17 = sphi %s6824_s17, %s20_s17   ;;  %s6780_s16 = sphi %s6822_s16, %s7687_s16   ;;  %s6776_s15 = sphi %s6820_s15, %s7686_s15   ;;  %s6772_s14 = sphi %s6818_s14, %s7685_s14   ;;  %s6768_s13 = sphi %s6816_s13, %s7684_s13   ;;  %s6764_s12 = sphi %s6814_s12, %s7683_s12  }
   0x8   : > { %p52_p0 = scmp.ne.s32.totalorder %s6768_s13, %s6764_s12  ;;  %p6848_p1 = scmp.eq.s32.totalorder %s6432_s18, 0 }
   0x9   : > { %p6852_p2 = scmp.eq.s32.totalorder %s6432_s18, 1  ;;  %p126_p3 = scmp.eq.s32.totalorder %s6433_s19, 1 }
   0xa   : > { %s7598_s20 = scalar_select %p6848_p1, 1, 0 }
   0xb   : > { %p6858_p4 = por %p6848_p1, %p52_p0  ;;  %p6434_p5 = scmp.ge.s32.totalorder %s6784_s17, 1 }
   0xc   : > { %p6863_p6 = por %p126_p3, %p52_p0  ;;  %p133_p7 = scmp.lt.s32.totalorder %s6784_s17, 3 }
   0xd   : > { %s6786_s25 = smov [#allocation6]   ;;  %s6787_s28 = smov [#allocation8]  }
   0xe   : > { %s7601_s23 = scalar_select %p6863_p6, 1, 0 }
   0xf   : > { %p6868_p8 = pnand %p6434_p5, %p133_p7  ;;  %s145_s26 = sshll.u32 %s6786_s25, 4  ;;  %s146_s26 = int_to_ptr.vmem [resolvable:$true] %s145_s26 }
  0x10   : > { %s159_s29 = sshll.u32 %s6787_s28, 4  ;;  %s6631_s30 = scalar_lea.vmem %s146_s26, 36864  ;;  %s160_s29 = int_to_ptr.vmem [resolvable:$true] %s159_s29 }
  0x11   : > { %p6545_p9 = pneg %p6868_p8  ;;  %p6632_p13 = scmp.ne.s32.totalorder %s146_s26, %s6631_s30 }
  0x12   : > { %p6639_p5 = scmp.lt.s32.totalorder %s146_s26, %s146_s26  ;;  %p6640_p7 = scmp.lt.s32.totalorder %s6631_s30, %s6631_s30 }
  0x13   : > { %p6877_p11 = pnand %p6545_p9, %p6848_p1 }
  0x14   : > { %p6641_p10 = por %p6640_p7, %p6639_p5 }
  0x15   : > { %p6622_p12 = pneg %p6877_p11 }
  0x17   : > { %p6634_p0 = pnand %p6632_p13, %p6622_p12 }
  0x19   : > { %p6635_p3 = pneg %p6634_p0 }
  0x1b   : > { %p6642_p9 = pnand %p6641_p10, %p6635_p3 }
  0x1d   : > { %6645 = shalt.err (!%p6642_p9)
}
  0x1e   : > { %s6788_s4 = smov 2048   ;;  %s6789_s5 = smov 128  }
  0x1f   : > { %6548 = dma.hbm_to_vmem [thread:$0]  (!%p6877_p11), %s7591_s1, 36864, %s146_s26, [#allocation7], %s6788_s4, %s6788_s4, %s6789_s5  }
  0x20   : > { %s6657_s8 = scalar_lea.vmem %s160_s29, 256  ;;  %p6665_p1 = scmp.lt.s32.totalorder %s160_s29, %s160_s29 }
  0x21   : > { %p6658_p6 = scmp.ne.s32.totalorder %s160_s29, %s6657_s8  ;;  %p6666_p5 = scmp.lt.s32.totalorder %s6657_s8, %s6657_s8 }
  0x23   : > { %p6660_p13 = pnand %p6658_p6, %p6622_p12  ;;  %p6667_p10 = por %p6666_p5, %p6665_p1 }
  0x25   : > { %p6661_p0 = pneg %p6660_p13 }
  0x27   : > { %p6668_p3 = pnand %p6667_p10, %p6661_p0 }
  0x29   : > { %6671 = shalt.err (!%p6668_p3)
}
  0x2a   : > { %6551 = dma.hbm_to_vmem [thread:$0]  (!%p6877_p11), %s7592_s2, 256, %s160_s29, [#allocation7]  }
  0x2b   : > { %s32_s11 = sadd.s32 1, %s6780_s16  ;;  %s39_s18 = sadd.s32 1, %s6772_s14 }
  0x2c   : > { %p34_p1 = scmp.ge.s32.totalorder %s32_s11, 2  ;;  %p46_p6 = scmp.ne.s32.totalorder %s6772_s14, %s6768_s13 }
  0x2d   : > { %p47_p12 = scmp.eq.s32.totalorder %s6784_s17, 0  ;;  %p6562_p7 = scmp.lt.s32.totalorder %s6784_s17, 2 }
  0x2e   : > { %s7689_s11 = smov (%p34_p1, %s32_s11), 0  ;;  %p6910_p13 = por %p6852_p2, %p46_p6 }
  0x2f   : > { %p48_p9 = por %p47_p12, %p46_p6  ;;  %s36_s25 = ssub.s32 %s6780_s16, %s7689_s11 }
  0x30   : > { %s170_s26 = sand.u32 1, %s6772_s14   ;;  %p37_p0 = scmp.eq.s32.totalorder %s36_s25, 0 }
  0x31   : > { %s6438_s27 = sshll.u32 %s170_s26, 4  ;;  %s6531_s28 = sshll.u32 %s6780_s16, 8 }
  0x32   : > { %s6919_s29 = scalar_select %p37_p0, %s6772_s14, %s39_s18  }
  0x33   : > { %s180_s6 = scalar_lea.hbm %s7590_s0, %s6531_s28  ;;  %s174_s7 = scalar_lea.vmem [#allocation3], %s6438_s27 }
  0x34   : > { %s181_s8 = sshll.u32 %s174_s7, 4  ;;  %p6926_p11 = pnand %p6562_p7, %p48_p9  ;;  %s182_s8 = int_to_ptr.vmem [resolvable:$true] %s181_s8 }
  0x35   : > { %s171_s9 = scalar_lea.sflag [#allocation4], %s170_s26  ;;  %s6685_s10 = scalar_lea.vmem %s182_s8, 256 }
  0x36   : > { %p6674_p2 = pneg %p6926_p11  ;;  %p6686_p5 = scmp.ne.s32.totalorder %s182_s8, %s6685_s10 }
  0x37   : > { %s6790_s18 = smov [#allocation3]  }
  0x38   : > { %p6688_p10 = pnand %p6686_p5, %p6674_p2  ;;  %s6690_s25 = sshll.u32 %s6790_s18, 4  ;;  %s6691_s25 = int_to_ptr.vmem [resolvable:$false] %s6690_s25 }
  0x39   : > { %s6692_s28 = scalar_lea.vmem %s6691_s25, 512  ;;  %p6693_p1 = scmp.lt.s32.totalorder %s182_s8, %s6691_s25 }
  0x3a   : > { %p6689_p3 = pneg %p6688_p10  ;;  %p6694_p6 = scmp.lt.s32.totalorder %s6692_s28, %s6685_s10 }
  0x3c   : > { %p6695_p12 = por %p6694_p6, %p6693_p1 }
  0x3e   : > { %p6696_p7 = pnand %p6695_p12, %p6689_p3 }
  0x40   : > { %6699 = shalt.err (!%p6696_p7)
}
  0x41   : > { %s6791_s27 = smov 8   ;;  %193 = sbr.rel (%p6868_p8) target bundleno = 508 (0x1fc), region = 32 }
  0x42   : > { %6555 = dma.hbm_to_vmem [thread:$0]  (!%p6926_p11), %s180_s6, 256, %s182_s8, %s171_s9, %s6789_s5, %s6789_s5, %s6791_s27  }
  0x46   : > { %s6939_s26 = sand.u32 1, %s6768_s13  }
  0x47   : > { %s6442_s30 = sshll.u32 %s6939_s26, 4  ;;  %s196_s4 = scalar_lea.sflag [#allocation4], %s6939_s26 }
  0x48   : > { %s6943_s7 = scalar_lea.vmem [#allocation3], %s6442_s30 }
  0x49   : > { %6751 = dma.done.wait (%p6858_p4), %s196_s4, 256  }
  0x4a   : > { %6753 = vsyncadd (%p6858_p4), %s196_s4, 4294967040  ;;  %p7606_p9 = scmp.ne.s32.totalorder %s7598_s20, 0 }
  0x4c   : > { %6755 = dma.done.wait (%p7606_p9), [#allocation7], 37120  }
  0x4d   : > { %6757 = vsyncadd (%p7606_p9), [#allocation7], 4294930176  ;;  %v6792_v0 = vmov 0.0   ;;  %v282_v1 = vld [vmem:[#allocation6 + $0x88] sm:$0xff]  ;;  %v284_v2 = vld [vmem:[#allocation6 + $0x98] sm:$0xff]  ;;  %vm297_vm0 = vcmask 130048  }
  0x4e   : > { %365 = vmatprep.mubr.f32.mxu0 %v6792_v0  ;;  %436 = vmatprep.mubr.f32.mxu1 %v6792_v0  ;;  %v281_v3 = vld [vmem:[#allocation6 + $0x80] sm:$0xff]  ;;  %v283_v4 = vld [vmem:[#allocation6 + $0x90] sm:$0xff]  ;;  %v266_v5 = vld [vmem:[#allocation6 + $0x8] sm:$0xff]  ;;  %s6445_s20 = sshll.u32 %s6939_s26, 7  ;;  %s6532_s24 = sshll.u32 %s6776_s15, 11 }
  0x4f   : > { %329 = vmatprep.subr.mxu0 %v282_v1  ;;  %400 = vmatprep.subr.mxu1 %v284_v2  ;;  %v268_v6 = vld [vmem:[#allocation6 + $0x18] sm:$0xff]  ;;  %v265_v7 = vld [vmem:[#allocation6] sm:$0xff]  ;;  %v267_v8 = vld [vmem:[#allocation6 + $0x10] sm:$0xff]  ;;  %s7483_s22 = scalar_lea.vmem [#allocation9], %s6445_s20  ;;  %s7546_s21 = scalar_lea.hbm %s7593_s3, %s6532_s24 }
  0x50   : > { %330 = vmatpush1.msra.mxu0 %v281_v3  ;;  %401 = vmatpush1.msra.mxu1 %v283_v4  ;;  %v6956_v9 = vld [vmem:[%s6943_s7] sm:$0xff]  ;;  %v286_v10 = vld [vmem:[#allocation6 + $0xa8] sm:$0xff]  ;;  %v288_v11 = vld [vmem:[#allocation6 + $0xb8] sm:$0xff]  ;;  %s6306_s5 = sshll.u32 %s7483_s22, 4  ;;  %s6290_s9 = scalar_lea.sflag [#allocation5], %s6939_s26  ;;  %s6307_s5 = int_to_ptr.vmem [resolvable:$true] %s6306_s5 }
  0x51   : > { %331 = vmatprep.subr.mxu0 %v266_v5  ;;  %402 = vmatprep.subr.mxu1 %v268_v6  ;;  %v285_v12 = vld [vmem:[#allocation6 + $0xa0] sm:$0xff]  ;;  %v287_v13 = vld [vmem:[#allocation6 + $0xb0] sm:$0xff]  ;;  %v270_v14 = vld [vmem:[#allocation6 + $0x28] sm:$0xff]  ;;  %s6700_s15 = scalar_lea.vmem %s6307_s5, 2048  ;;  %s6793_s10 = smov [#allocation9]  }
  0x52   : > { %332 = vmatpush1.msra.mxu0 %v265_v7  ;;  %403 = vmatpush1.msra.mxu1 %v267_v8  ;;  %v272_v15 = vld [vmem:[#allocation6 + $0x38] sm:$0xff]  ;;  %v269_v16 = vld [vmem:[#allocation6 + $0x20] sm:$0xff]  ;;  %v271_v17 = vld [vmem:[#allocation6 + $0x30] sm:$0xff]  ;;  %p6701_p4 = scmp.ne.s32.totalorder %s6307_s5, %s6700_s15  ;;  %s6704_s18 = sshll.u32 %s6793_s10, 4  ;;  %s6705_s18 = int_to_ptr.vmem [resolvable:$false] %s6704_s18 }
  0x53   : > { %6446 = vmatmul.mubr.msk.f32.vlgmr.msra.gmra.mxu0 %vm297_vm0, %v6956_v9  ;;  %6447 = vmatmul.mubr.msk.f32.vlgmr.msra.gmra.mxu1 %vm297_vm0, %v6956_v9  ;;  %v290_v18 = vld [vmem:[#allocation6 + $0xc8] sm:$0xff]  ;;  %v292_v19 = vld [vmem:[#allocation6 + $0xd8] sm:$0xff]  ;;  %v289_v20 = vld [vmem:[#allocation6 + $0xc0] sm:$0xff]  ;;  %s6706_s25 = scalar_lea.vmem %s6705_s18, 4096  ;;  %p6707_p11 = scmp.lt.s32.totalorder %s6307_s5, %s6705_s18 }
  0x54   : > { %471 = vmatprep.subr.mxu0 %v286_v10  ;;  %542 = vmatprep.subr.mxu1 %v288_v11  ;;  %v291_v21 = vld [vmem:[#allocation6 + $0xd0] sm:$0xff]  ;;  %v274_v22 = vld [vmem:[#allocation6 + $0x48] sm:$0xff]  ;;  %v276_v23 = vld [vmem:[#allocation6 + $0x58] sm:$0xff]  ;;  %p6702_p8 = pnand %p6701_p4, %p6910_p13  ;;  %p6708_p2 = scmp.lt.s32.totalorder %s6706_s25, %s6700_s15 }
  0x55   : > { %472 = vmatpush1.msra.mxu0 %v285_v12  ;;  %543 = vmatpush1.msra.mxu1 %v287_v13  ;;  %v273_v24 = vld [vmem:[#allocation6 + $0x40] sm:$0xff]  ;;  %v275_v25 = vld [vmem:[#allocation6 + $0x50] sm:$0xff]  ;;  %v294_v26 = vld [vmem:[#allocation6 + $0xe8] sm:$0xff] }
  0x56   : > { %473 = vmatprep.subr.mxu0 %v270_v14  ;;  %544 = vmatprep.subr.mxu1 %v272_v15  ;;  %v296_v27 = vld [vmem:[#allocation6 + $0xf8] sm:$0xff]  ;;  %v293_v28 = vld [vmem:[#allocation6 + $0xe0] sm:$0xff]  ;;  %v295_v29 = vld [vmem:[#allocation6 + $0xf0] sm:$0xff]  ;;  %p6703_p0 = pneg %p6702_p8  ;;  %p6709_p5 = por %p6708_p2, %p6707_p11 }
  0x57   : > { %474 = vmatpush1.msra.mxu0 %v269_v16  ;;  %507 = vmatprep.mubr.f32.mxu0 %v6792_v0  ;;  %v278_v30 = vld [vmem:[#allocation6 + $0x68] sm:$0xff]  ;;  %v280_v31 = vld [vmem:[#allocation6 + $0x78] sm:$0xff]  ;;  %v277_v32 = vld [vmem:[#allocation6 + $0x60] sm:$0xff] }
  0x58   : > { %545 = vmatpush1.msra.mxu1 %v271_v17  ;;  %578 = vmatprep.mubr.f32.mxu1 %v6792_v0  ;;  %v279_v33 = vld [vmem:[#allocation6 + $0x70] sm:$0xff]  ;;  %v938_v34 = vld [vmem:[#allocation6 + $0x188] sm:$0xff]  ;;  %v940_v35 = vld [vmem:[#allocation6 + $0x198] sm:$0xff]  ;;  %p6710_p10 = pnand %p6709_p5, %p6703_p0 }
  0x59   : > { %6448 = vmatmul.mubr.msk.f32.vlgmr.msra.gmra.mxu0 %vm297_vm0, %v6956_v9  ;;  %6449 = vmatmul.mubr.msk.f32.vlgmr.msra.gmra.mxu1 %vm297_vm0, %v6956_v9  ;;  %v937_v36 = vld [vmem:[#allocation6 + $0x180] sm:$0xff]  ;;  %v939_v37 = vld [vmem:[#allocation6 + $0x190] sm:$0xff]  ;;  %v922_v38 = vld [vmem:[#allocation6 + $0x108] sm:$0xff] }
  0x5a   : > { %613 = vmatprep.subr.mxu0 %v290_v18  ;;  %684 = vmatprep.subr.mxu1 %v292_v19  ;;  %v924_v39 = vld [vmem:[#allocation6 + $0x118] sm:$0xff]  ;;  %v921_v40 = vld [vmem:[#allocation6 + $0x100] sm:$0xff]  ;;  %v923_v41 = vld [vmem:[#allocation6 + $0x110] sm:$0xff] }
  0x5b   : > { %614 = vmatpush1.msra.mxu0 %v289_v20  ;;  %685 = vmatpush1.msra.mxu1 %v291_v21  ;;  %v6981_v42 = vld [vmem:[%s6943_s7 + $0x1] sm:$0xff] }
  0x5c   : > { %615 = vmatprep.subr.mxu0 %v274_v22  ;;  %686 = vmatprep.subr.mxu1 %v276_v23  ;;  %v942_v43 = vld [vmem:[#allocation6 + $0x1a8] sm:$0xff]  ;;  %v944_v44 = vld [vmem:[#allocation6 + $0x1b8] sm:$0xff]  ;;  %v941_v45 = vld [vmem:[#allocation6 + $0x1a0] sm:$0xff] }
  0x5d   : > { %616 = vmatpush1.msra.mxu0 %v273_v24  ;;  %649 = vmatprep.mubr.f32.mxu0 %v6792_v0  ;;  %v943_v46 = vld [vmem:[#allocation6 + $0x1b0] sm:$0xff]  ;;  %v926_v47 = vld [vmem:[#allocation6 + $0x128] sm:$0xff]  ;;  %v928_v48 = vld [vmem:[#allocation6 + $0x138] sm:$0xff] }
  0x5e   : > { %687 = vmatpush1.msra.mxu1 %v275_v25  ;;  %720 = vmatprep.mubr.f32.mxu1 %v6792_v0  ;;  %v925_v49 = vld [vmem:[#allocation6 + $0x120] sm:$0xff]  ;;  %v927_v50 = vld [vmem:[#allocation6 + $0x130] sm:$0xff]  ;;  %v946_v51 = vld [vmem:[#allocation6 + $0x1c8] sm:$0xff] }
  0x5f   : > { %6450 = vmatmul.mubr.msk.f32.vlgmr.msra.gmra.mxu0 %vm297_vm0, %v6956_v9  ;;  %6451 = vmatmul.mubr.msk.f32.vlgmr.msra.gmra.mxu1 %vm297_vm0, %v6956_v9  ;;  %v948_v52 = vld [vmem:[#allocation6 + $0x1d8] sm:$0xff]  ;;  %v945_v53 = vld [vmem:[#allocation6 + $0x1c0] sm:$0xff]  ;;  %v947_v54 = vld [vmem:[#allocation6 + $0x1d0] sm:$0xff] }
  0x60   : > { %755 = vmatprep.subr.mxu0 %v294_v26  ;;  %826 = vmatprep.subr.mxu1 %v296_v27  ;;  %v930_v55 = vld [vmem:[#allocation6 + $0x148] sm:$0xff]  ;;  %v932_v56 = vld [vmem:[#allocation6 + $0x158] sm:$0xff]  ;;  %v929_v57 = vld [vmem:[#allocation6 + $0x140] sm:$0xff] }
  0x61   : > { %756 = vmatpush1.msra.mxu0 %v293_v28  ;;  %827 = vmatpush1.msra.mxu1 %v295_v29  ;;  %v931_v58 = vld [vmem:[#allocation6 + $0x150] sm:$0xff]  ;;  %v950_v59 = vld [vmem:[#allocation6 + $0x1e8] sm:$0xff]  ;;  %v952_v60 = vld [vmem:[#allocation6 + $0x1f8] sm:$0xff] }
  0x62   : > { %757 = vmatprep.subr.mxu0 %v278_v30  ;;  %828 = vmatprep.subr.mxu1 %v280_v31  ;;  %v949_v61 = vld [vmem:[#allocation6 + $0x1e0] sm:$0xff]  ;;  %v951_v62 = vld [vmem:[#allocation6 + $0x1f0] sm:$0xff]  ;;  %v934_v63 = vld [vmem:[#allocation6 + $0x168] sm:$0xff] }
  0x63   : > { %758 = vmatpush1.msra.mxu0 %v277_v32  ;;  %791 = vmatprep.mubr.f32.mxu0 %v6792_v0  ;;  %v936_v1 = vld [vmem:[#allocation6 + $0x178] sm:$0xff]  ;;  %v933_v2 = vld [vmem:[#allocation6 + $0x160] sm:$0xff]  ;;  %v935_v3 = vld [vmem:[#allocation6 + $0x170] sm:$0xff] }
  0x64   : > { %829 = vmatpush1.msra.mxu1 %v279_v33  ;;  %862 = vmatprep.mubr.f32.mxu1 %v6792_v0  ;;  %v1593_v4 = vld [vmem:[#allocation6 + $0x288] sm:$0xff]  ;;  %v1595_v5 = vld [vmem:[#allocation6 + $0x298] sm:$0xff]  ;;  %v1592_v6 = vld [vmem:[#allocation6 + $0x280] sm:$0xff] }
  0x65   : > { %6452 = vmatmul.mubr.msk.f32.vlgmr.msra.gmra.mxu0 %vm297_vm0, %v6956_v9  ;;  %6453 = vmatmul.mubr.msk.f32.vlgmr.msra.gmra.mxu1 %vm297_vm0, %v6956_v9  ;;  %v1594_v7 = vld [vmem:[#allocation6 + $0x290] sm:$0xff]  ;;  %v1577_v8 = vld [vmem:[#allocation6 + $0x208] sm:$0xff]  ;;  %v1579_v9 = vld [vmem:[#allocation6 + $0x218] sm:$0xff] }
  0x66   : > { %984 = vmatprep.subr.mxu0 %v938_v34  ;;  %1055 = vmatprep.subr.mxu1 %v940_v35  ;;  %v1576_v10 = vld [vmem:[#allocation6 + $0x200] sm:$0xff]  ;;  %v1578_v11 = vld [vmem:[#allocation6 + $0x210] sm:$0xff]  ;;  %v1597_v13 = vld [vmem:[#allocation6 + $0x2a8] sm:$0xff] }
  0x67   : > { %985 = vmatpush1.msra.mxu0 %v937_v36  ;;  %1056 = vmatpush1.msra.mxu1 %v939_v37  ;;  %v7008_v12 = vld [vmem:[%s6943_s7 + $0x2] sm:$0xff] }
  0x68   : > { %986 = vmatprep.subr.mxu0 %v922_v38  ;;  %1057 = vmatprep.subr.mxu1 %v924_v39  ;;  %v1599_v14 = vld [vmem:[#allocation6 + $0x2b8] sm:$0xff]  ;;  %v1596_v15 = vld [vmem:[#allocation6 + $0x2a0] sm:$0xff]  ;;  %v1598_v16 = vld [vmem:[#allocation6 + $0x2b0] sm:$0xff] }
  0x69   : > { %987 = vmatpush1.msra.mxu0 %v921_v40  ;;  %1020 = vmatprep.mubr.f32.mxu0 %v6792_v0  ;;  %v1581_v17 = vld [vmem:[#allocation6 + $0x228] sm:$0xff]  ;;  %v1583_v18 = vld [vmem:[#allocation6 + $0x238] sm:$0xff]  ;;  %v1580_v19 = vld [vmem:[#allocation6 + $0x220] sm:$0xff] }
  0x6a   : > { %1058 = vmatpush1.msra.mxu1 %v923_v41  ;;  %1091 = vmatprep.mubr.f32.mxu1 %v6792_v0  ;;  %v1582_v20 = vld [vmem:[#allocation6 + $0x230] sm:$0xff]  ;;  %v1601_v21 = vld [vmem:[#allocation6 + $0x2c8] sm:$0xff]  ;;  %v1603_v22 = vld [vmem:[#allocation6 + $0x2d8] sm:$0xff] }
  0x6b   : > { %6455 = vmatmul.mubr.msk.f32.vlgmr.msra.gmra.mxu0 %vm297_vm0, %v6981_v42  ;;  %6456 = vmatmul.mubr.msk.f32.vlgmr.msra.gmra.mxu1 %vm297_vm0, %v6981_v42  ;;  %v1600_v23 = vld [vmem:[#allocation6 + $0x2c0] sm:$0xff]  ;;  %v1602_v24 = vld [vmem:[#allocation6 + $0x2d0] sm:$0xff]  ;;  %v1585_v25 = vld [vmem:[#allocation6 + $0x248] sm:$0xff] }
  0x6c   : > { %1126 = vmatprep.subr.mxu0 %v942_v43  ;;  %1197 = vmatprep.subr.mxu1 %v944_v44  ;;  %v1587_v26 = vld [vmem:[#allocation6 + $0x258] sm:$0xff]  ;;  %v1584_v27 = vld [vmem:[#allocation6 + $0x240] sm:$0xff]  ;;  %v1586_v28 = vld [vmem:[#allocation6 + $0x250] sm:$0xff] }
  0x6d   : > { %1127 = vmatpush1.msra.mxu0 %v941_v45  ;;  %1198 = vmatpush1.msra.mxu1 %v943_v46  ;;  %v1605_v29 = vld [vmem:[#allocation6 + $0x2e8] sm:$0xff]  ;;  %v1607_v30 = vld [vmem:[#allocation6 + $0x2f8] sm:$0xff]  ;;  %v1604_v31 = vld [vmem:[#allocation6 + $0x2e0] sm:$0xff] }
  0x6e   : > { %1128 = vmatprep.subr.mxu0 %v926_v47  ;;  %1199 = vmatprep.subr.mxu1 %v928_v48  ;;  %v1606_v32 = vld [vmem:[#allocation6 + $0x2f0] sm:$0xff]  ;;  %v1589_v33 = vld [vmem:[#allocation6 + $0x268] sm:$0xff]  ;;  %v1591_v34 = vld [vmem:[#allocation6 + $0x278] sm:$0xff] }
  0x6f   : > { %1129 = vmatpush1.msra.mxu0 %v925_v49  ;;  %1162 = vmatprep.mubr.f32.mxu0 %v6792_v0  ;;  %v1588_v35 = vld [vmem:[#allocation6 + $0x260] sm:$0xff]  ;;  %v1590_v36 = vld [vmem:[#allocation6 + $0x270] sm:$0xff]  ;;  %v2248_v37 = vld [vmem:[#allocation6 + $0x388] sm:$0xff] }
  0x70   : > { %1200 = vmatpush1.msra.mxu1 %v927_v50  ;;  %1233 = vmatprep.mubr.f32.mxu1 %v6792_v0  ;;  %v2250_v38 = vld [vmem:[#allocation6 + $0x398] sm:$0xff]  ;;  %v2247_v39 = vld [vmem:[#allocation6 + $0x380] sm:$0xff]  ;;  %v2249_v40 = vld [vmem:[#allocation6 + $0x390] sm:$0xff] }
  0x71   : > { %6457 = vmatmul.mubr.msk.f32.vlgmr.msra.gmra.mxu0 %vm297_vm0, %v6981_v42  ;;  %6458 = vmatmul.mubr.msk.f32.vlgmr.msra.gmra.mxu1 %vm297_vm0, %v6981_v42  ;;  %v2232_v41 = vld [vmem:[#allocation6 + $0x308] sm:$0xff]  ;;  %v2231_v43 = vld [vmem:[#allocation6 + $0x300] sm:$0xff]  ;;  %v2233_v44 = vld [vmem:[#allocation6 + $0x310] sm:$0xff] }
  0x72   : > { %1268 = vmatprep.subr.mxu0 %v946_v51  ;;  %1339 = vmatprep.subr.mxu1 %v948_v52  ;;  %v7035_v45 = vld [vmem:[%s6943_s7 + $0x3] sm:$0xff] }
  0x73   : > { %1269 = vmatpush1.msra.mxu0 %v945_v53  ;;  %1340 = vmatpush1.msra.mxu1 %v947_v54  ;;  %v2252_v46 = vld [vmem:[#allocation6 + $0x3a8] sm:$0xff]  ;;  %v2254_v47 = vld [vmem:[#allocation6 + $0x3b8] sm:$0xff]  ;;  %v2251_v48 = vld [vmem:[#allocation6 + $0x3a0] sm:$0xff] }
  0x74   : > { %1270 = vmatprep.subr.mxu0 %v930_v55  ;;  %1341 = vmatprep.subr.mxu1 %v932_v56  ;;  %v2253_v49 = vld [vmem:[#allocation6 + $0x3b0] sm:$0xff]  ;;  %v2236_v50 = vld [vmem:[#allocation6 + $0x328] sm:$0xff]  ;;  %v2238_v51 = vld [vmem:[#allocation6 + $0x338] sm:$0xff] }
  0x75   : > { %1271 = vmatpush1.msra.mxu0 %v929_v57  ;;  %1304 = vmatprep.mubr.f32.mxu0 %v6792_v0  ;;  %v2235_v52 = vld [vmem:[#allocation6 + $0x320] sm:$0xff]  ;;  %v2237_v53 = vld [vmem:[#allocation6 + $0x330] sm:$0xff]  ;;  %v2256_v54 = vld [vmem:[#allocation6 + $0x3c8] sm:$0xff] }
  0x76   : > { %1342 = vmatpush1.msra.mxu1 %v931_v58  ;;  %1375 = vmatprep.mubr.f32.mxu1 %v6792_v0  ;;  %v2258_v55 = vld [vmem:[#allocation6 + $0x3d8] sm:$0xff]  ;;  %v2255_v56 = vld [vmem:[#allocation6 + $0x3c0] sm:$0xff]  ;;  %v2257_v57 = vld [vmem:[#allocation6 + $0x3d0] sm:$0xff] }
  0x77   : > { %6459 = vmatmul.mubr.msk.f32.vlgmr.msra.gmra.mxu0 %vm297_vm0, %v6981_v42  ;;  %6460 = vmatmul.mubr.msk.f32.vlgmr.msra.gmra.mxu1 %vm297_vm0, %v6981_v42  ;;  %v2240_v58 = vld [vmem:[#allocation6 + $0x348] sm:$0xff] }
  0x78   : > { %1410 = vmatprep.subr.mxu0 %v950_v59  ;;  %1481 = vmatprep.subr.mxu1 %v952_v60  ;;  %v2242_v59 = vld [vmem:[#allocation6 + $0x358] sm:$0xff]  ;;  %v2239_v60 = vld [vmem:[#allocation6 + $0x340] sm:$0xff] }
  0x79   : > { %1411 = vmatpush1.msra.mxu0 %v949_v61  ;;  %1482 = vmatpush1.msra.mxu1 %v951_v62  ;;  %v2241_v61 = vld [vmem:[#allocation6 + $0x350] sm:$0xff]  ;;  %v2260_v62 = vld [vmem:[#allocation6 + $0x3e8] sm:$0xff] }
  0x7a   : > { %1412 = vmatprep.subr.mxu0 %v934_v63  ;;  %1483 = vmatprep.subr.mxu1 %v936_v1  ;;  %v2262_v63 = vld [vmem:[#allocation6 + $0x3f8] sm:$0xff]  ;;  %v2259_v1 = vld [vmem:[#allocation6 + $0x3e0] sm:$0xff] }
  0x7b   : > { %1413 = vmatpush1.msra.mxu0 %v933_v2  ;;  %1446 = vmatprep.mubr.f32.mxu0 %v6792_v0  ;;  %v2261_v2 = vld [vmem:[#allocation6 + $0x3f0] sm:$0xff] }
  0x7c   : > { %1484 = vmatpush1.msra.mxu1 %v935_v3  ;;  %1517 = vmatprep.mubr.f32.mxu1 %v6792_v0  ;;  %v2244_v3 = vld [vmem:[#allocation6 + $0x368] sm:$0xff] }
  0x7d   : > { %6461 = vmatmul.mubr.msk.f32.vlgmr.msra.gmra.mxu0 %vm297_vm0, %v6981_v42  ;;  %6462 = vmatmul.mubr.msk.f32.vlgmr.msra.gmra.mxu1 %vm297_vm0, %v6981_v42  ;;  %v2234_v42 = vld [vmem:[#allocation6 + $0x318] sm:$0xff] }
  0x7e   : > { %1639 = vmatprep.subr.mxu0 %v1593_v4  ;;  %1710 = vmatprep.subr.mxu1 %v1595_v5  ;;  %v2246_v4 = vld [vmem:[#allocation6 + $0x378] sm:$0xff]  ;;  %v2243_v5 = vld [vmem:[#allocation6 + $0x360] sm:$0xff] }
  0x7f   : > { %1640 = vmatpush1.msra.mxu0 %v1592_v6  ;;  %1711 = vmatpush1.msra.mxu1 %v1594_v7  ;;  %v2245_v6 = vld [vmem:[#allocation6 + $0x370] sm:$0xff]  ;;  %v2903_v7 = vld [vmem:[#allocation6 + $0x488] sm:$0xff] }
  0x80   : > { %1641 = vmatprep.subr.mxu0 %v1577_v8  ;;  %1712 = vmatprep.subr.mxu1 %v1579_v9  ;;  %v2905_v8 = vld [vmem:[#allocation6 + $0x498] sm:$0xff]  ;;  %v2902_v9 = vld [vmem:[#allocation6 + $0x480] sm:$0xff] }
  0x81   : > { %1642 = vmatpush1.msra.mxu0 %v1576_v10  ;;  %1675 = vmatprep.mubr.f32.mxu0 %v6792_v0  ;;  %v2904_v10 = vld [vmem:[#allocation6 + $0x490] sm:$0xff] }
  0x82   : > { %1713 = vmatpush1.msra.mxu1 %v1578_v11  ;;  %1746 = vmatprep.mubr.f32.mxu1 %v6792_v0  ;;  %v2887_v11 = vld [vmem:[#allocation6 + $0x408] sm:$0xff] }
  0x83   : > { %6464 = vmatmul.mubr.msk.f32.vlgmr.msra.gmra.mxu0 %vm297_vm0, %v7008_v12  ;;  %6465 = vmatmul.mubr.msk.f32.vlgmr.msra.gmra.mxu1 %vm297_vm0, %v7008_v12 }
  0x84   : > { %1781 = vmatprep.subr.mxu0 %v1597_v13  ;;  %1852 = vmatprep.subr.mxu1 %v1599_v14  ;;  %v2886_v13 = vld [vmem:[#allocation6 + $0x400] sm:$0xff]  ;;  %v2888_v14 = vld [vmem:[#allocation6 + $0x410] sm:$0xff] }
  0x85   : > { %1782 = vmatpush1.msra.mxu0 %v1596_v15  ;;  %1853 = vmatpush1.msra.mxu1 %v1598_v16  ;;  %v7062_v15 = vld [vmem:[%s6943_s7 + $0x4] sm:$0xff] }
  0x86   : > { %1783 = vmatprep.subr.mxu0 %v1581_v17  ;;  %1854 = vmatprep.subr.mxu1 %v1583_v18  ;;  %v2907_v16 = vld [vmem:[#allocation6 + $0x4a8] sm:$0xff]  ;;  %v2909_v17 = vld [vmem:[#allocation6 + $0x4b8] sm:$0xff]  ;;  %v2906_v18 = vld [vmem:[#allocation6 + $0x4a0] sm:$0xff] }
  0x87   : > { %1784 = vmatpush1.msra.mxu0 %v1580_v19  ;;  %1817 = vmatprep.mubr.f32.mxu0 %v6792_v0  ;;  %v2908_v19 = vld [vmem:[#allocation6 + $0x4b0] sm:$0xff] }
  0x88   : > { %1855 = vmatpush1.msra.mxu1 %v1582_v20  ;;  %1888 = vmatprep.mubr.f32.mxu1 %v6792_v0  ;;  %v2891_v20 = vld [vmem:[#allocation6 + $0x428] sm:$0xff] }
  0x89   : > { %6466 = vmatmul.mubr.msk.f32.vlgmr.msra.gmra.mxu0 %vm297_vm0, %v7008_v12  ;;  %6467 = vmatmul.mubr.msk.f32.vlgmr.msra.gmra.mxu1 %vm297_vm0, %v7008_v12 }
  0x8a   : > { %1923 = vmatprep.subr.mxu0 %v1601_v21  ;;  %1994 = vmatprep.subr.mxu1 %v1603_v22  ;;  %v2893_v21 = vld [vmem:[#allocation6 + $0x438] sm:$0xff]  ;;  %v2890_v22 = vld [vmem:[#allocation6 + $0x420] sm:$0xff] }
  0x8b   : > { %1924 = vmatpush1.msra.mxu0 %v1600_v23  ;;  %1995 = vmatpush1.msra.mxu1 %v1602_v24  ;;  %v2892_v23 = vld [vmem:[#allocation6 + $0x430] sm:$0xff]  ;;  %v2911_v24 = vld [vmem:[#allocation6 + $0x4c8] sm:$0xff] }
  0x8c   : > { %1925 = vmatprep.subr.mxu0 %v1585_v25  ;;  %1996 = vmatprep.subr.mxu1 %v1587_v26  ;;  %v2913_v25 = vld [vmem:[#allocation6 + $0x4d8] sm:$0xff]  ;;  %v2910_v26 = vld [vmem:[#allocation6 + $0x4c0] sm:$0xff] }
  0x8d   : > { %1926 = vmatpush1.msra.mxu0 %v1584_v27  ;;  %1959 = vmatprep.mubr.f32.mxu0 %v6792_v0  ;;  %v2912_v27 = vld [vmem:[#allocation6 + $0x4d0] sm:$0xff] }
  0x8e   : > { %1997 = vmatpush1.msra.mxu1 %v1586_v28  ;;  %2030 = vmatprep.mubr.f32.mxu1 %v6792_v0  ;;  %v2895_v28 = vld [vmem:[#allocation6 + $0x448] sm:$0xff] }
  0x8f   : > { %6468 = vmatmul.mubr.msk.f32.vlgmr.msra.gmra.mxu0 %vm297_vm0, %v7008_v12  ;;  %6469 = vmatmul.mubr.msk.f32.vlgmr.msra.gmra.mxu1 %vm297_vm0, %v7008_v12 }
  0x90   : > { %2065 = vmatprep.subr.mxu0 %v1605_v29  ;;  %2136 = vmatprep.subr.mxu1 %v1607_v30  ;;  %v2897_v29 = vld [vmem:[#allocation6 + $0x458] sm:$0xff]  ;;  %v2894_v30 = vld [vmem:[#allocation6 + $0x440] sm:$0xff] }
  0x91   : > { %2066 = vmatpush1.msra.mxu0 %v1604_v31  ;;  %2137 = vmatpush1.msra.mxu1 %v1606_v32  ;;  %v2896_v31 = vld [vmem:[#allocation6 + $0x450] sm:$0xff]  ;;  %v2915_v32 = vld [vmem:[#allocation6 + $0x4e8] sm:$0xff] }
  0x92   : > { %2067 = vmatprep.subr.mxu0 %v1589_v33  ;;  %2138 = vmatprep.subr.mxu1 %v1591_v34  ;;  %v2917_v33 = vld [vmem:[#allocation6 + $0x4f8] sm:$0xff]  ;;  %v2914_v34 = vld [vmem:[#allocation6 + $0x4e0] sm:$0xff] }
  0x93   : > { %2068 = vmatpush1.msra.mxu0 %v1588_v35  ;;  %2101 = vmatprep.mubr.f32.mxu0 %v6792_v0  ;;  %v2916_v35 = vld [vmem:[#allocation6 + $0x4f0] sm:$0xff] }
  0x94   : > { %2139 = vmatpush1.msra.mxu1 %v1590_v36  ;;  %2172 = vmatprep.mubr.f32.mxu1 %v6792_v0  ;;  %v2899_v36 = vld [vmem:[#allocation6 + $0x468] sm:$0xff] }
  0x95   : > { %6470 = vmatmul.mubr.msk.f32.vlgmr.msra.gmra.mxu0 %vm297_vm0, %v7008_v12  ;;  %6471 = vmatmul.mubr.msk.f32.vlgmr.msra.gmra.mxu1 %vm297_vm0, %v7008_v12  ;;  %v2889_v12 = vld [vmem:[#allocation6 + $0x418] sm:$0xff] }
  0x96   : > { %2294 = vmatprep.subr.mxu0 %v2248_v37  ;;  %2365 = vmatprep.subr.mxu1 %v2250_v38  ;;  %v2901_v37 = vld [vmem:[#allocation6 + $0x478] sm:$0xff]  ;;  %v2898_v38 = vld [vmem:[#allocation6 + $0x460] sm:$0xff] }
  0x97   : > { %2295 = vmatpush1.msra.mxu0 %v2247_v39  ;;  %2366 = vmatpush1.msra.mxu1 %v2249_v40  ;;  %v2900_v39 = vld [vmem:[#allocation6 + $0x470] sm:$0xff]  ;;  %v3558_v40 = vld [vmem:[#allocation6 + $0x588] sm:$0xff] }
  0x98   : > { %2296 = vmatprep.subr.mxu0 %v2232_v41  ;;  %2367 = vmatprep.subr.mxu1 %v2234_v42  ;;  %v3560_v41 = vld [vmem:[#allocation6 + $0x598] sm:$0xff]  ;;  %v3557_v42 = vld [vmem:[#allocation6 + $0x580] sm:$0xff] }
  0x99   : > { %2297 = vmatpush1.msra.mxu0 %v2231_v43  ;;  %2330 = vmatprep.mubr.f32.mxu0 %v6792_v0  ;;  %v3559_v43 = vld [vmem:[#allocation6 + $0x590] sm:$0xff] }
  0x9a   : > { %2368 = vmatpush1.msra.mxu1 %v2233_v44  ;;  %2401 = vmatprep.mubr.f32.mxu1 %v6792_v0  ;;  %v3542_v44 = vld [vmem:[#allocation6 + $0x508] sm:$0xff] }
  0x9b   : > { %6473 = vmatmul.mubr.msk.f32.vlgmr.msra.gmra.mxu0 %vm297_vm0, %v7035_v45  ;;  %6474 = vmatmul.mubr.msk.f32.vlgmr.msra.gmra.mxu1 %vm297_vm0, %v7035_v45 }
  0x9c   : > { %2436 = vmatprep.subr.mxu0 %v2252_v46  ;;  %2507 = vmatprep.subr.mxu1 %v2254_v47  ;;  %v3541_v46 = vld [vmem:[#allocation6 + $0x500] sm:$0xff]  ;;  %v3543_v47 = vld [vmem:[#allocation6 + $0x510] sm:$0xff] }
  0x9d   : > { %2437 = vmatpush1.msra.mxu0 %v2251_v48  ;;  %2508 = vmatpush1.msra.mxu1 %v2253_v49  ;;  %v7089_v48 = vld [vmem:[%s6943_s7 + $0x5] sm:$0xff] }
  0x9e   : > { %2438 = vmatprep.subr.mxu0 %v2236_v50  ;;  %2509 = vmatprep.subr.mxu1 %v2238_v51  ;;  %v3562_v49 = vld [vmem:[#allocation6 + $0x5a8] sm:$0xff]  ;;  %v3564_v50 = vld [vmem:[#allocation6 + $0x5b8] sm:$0xff]  ;;  %v3561_v51 = vld [vmem:[#allocation6 + $0x5a0] sm:$0xff] }
  0x9f   : > { %2439 = vmatpush1.msra.mxu0 %v2235_v52  ;;  %2472 = vmatprep.mubr.f32.mxu0 %v6792_v0  ;;  %v3563_v52 = vld [vmem:[#allocation6 + $0x5b0] sm:$0xff] }
  0xa0   : > { %2510 = vmatpush1.msra.mxu1 %v2237_v53  ;;  %2543 = vmatprep.mubr.f32.mxu1 %v6792_v0  ;;  %v3546_v53 = vld [vmem:[#allocation6 + $0x528] sm:$0xff] }
  0xa1   : > { %6475 = vmatmul.mubr.msk.f32.vlgmr.msra.gmra.mxu0 %vm297_vm0, %v7035_v45  ;;  %6476 = vmatmul.mubr.msk.f32.vlgmr.msra.gmra.mxu1 %vm297_vm0, %v7035_v45 }
  0xa2   : > { %2578 = vmatprep.subr.mxu0 %v2256_v54  ;;  %2649 = vmatprep.subr.mxu1 %v2258_v55  ;;  %v3548_v54 = vld [vmem:[#allocation6 + $0x538] sm:$0xff]  ;;  %v3545_v55 = vld [vmem:[#allocation6 + $0x520] sm:$0xff] }
  0xa3   : > { %2579 = vmatpush1.msra.mxu0 %v2255_v56  ;;  %2650 = vmatpush1.msra.mxu1 %v2257_v57  ;;  %v3547_v56 = vld [vmem:[#allocation6 + $0x530] sm:$0xff]  ;;  %v3566_v57 = vld [vmem:[#allocation6 + $0x5c8] sm:$0xff] }
  0xa4   : > { %2580 = vmatprep.subr.mxu0 %v2240_v58  ;;  %2651 = vmatprep.subr.mxu1 %v2242_v59  ;;  %v3568_v58 = vld [vmem:[#allocation6 + $0x5d8] sm:$0xff]  ;;  %v3565_v59 = vld [vmem:[#allocation6 + $0x5c0] sm:$0xff] }
  0xa5   : > { %2581 = vmatpush1.msra.mxu0 %v2239_v60  ;;  %2614 = vmatprep.mubr.f32.mxu0 %v6792_v0  ;;  %v3567_v60 = vld [vmem:[#allocation6 + $0x5d0] sm:$0xff] }
  0xa6   : > { %2652 = vmatpush1.msra.mxu1 %v2241_v61  ;;  %2685 = vmatprep.mubr.f32.mxu1 %v6792_v0  ;;  %v3550_v61 = vld [vmem:[#allocation6 + $0x548] sm:$0xff] }
  0xa7   : > { %6477 = vmatmul.mubr.msk.f32.vlgmr.msra.gmra.mxu0 %vm297_vm0, %v7035_v45  ;;  %6478 = vmatmul.mubr.msk.f32.vlgmr.msra.gmra.mxu1 %vm297_vm0, %v7035_v45 }
  0xa8   : > { %2720 = vmatprep.subr.mxu0 %v2260_v62  ;;  %2791 = vmatprep.subr.mxu1 %v2262_v63  ;;  %v3552_v62 = vld [vmem:[#allocation6 + $0x558] sm:$0xff]  ;;  %v3549_v63 = vld [vmem:[#allocation6 + $0x540] sm:$0xff] }
  0xa9   : > { %2721 = vmatpush1.msra.mxu0 %v2259_v1  ;;  %2792 = vmatpush1.msra.mxu1 %v2261_v2  ;;  %v3551_v1 = vld [vmem:[#allocation6 + $0x550] sm:$0xff]  ;;  %v3570_v2 = vld [vmem:[#allocation6 + $0x5e8] sm:$0xff] }
  0xaa   : > { %2722 = vmatprep.subr.mxu0 %v2244_v3  ;;  %2793 = vmatprep.subr.mxu1 %v2246_v4  ;;  %v3572_v3 = vld [vmem:[#allocation6 + $0x5f8] sm:$0xff]  ;;  %v3569_v4 = vld [vmem:[#allocation6 + $0x5e0] sm:$0xff] }
  0xab   : > { %2723 = vmatpush1.msra.mxu0 %v2243_v5  ;;  %2756 = vmatprep.mubr.f32.mxu0 %v6792_v0  ;;  %v3571_v5 = vld [vmem:[#allocation6 + $0x5f0] sm:$0xff] }
  0xac   : > { %2794 = vmatpush1.msra.mxu1 %v2245_v6  ;;  %2827 = vmatprep.mubr.f32.mxu1 %v6792_v0  ;;  %v3554_v6 = vld [vmem:[#allocation6 + $0x568] sm:$0xff] }
  0xad   : > { %6479 = vmatmul.mubr.msk.f32.vlgmr.msra.gmra.mxu0 %vm297_vm0, %v7035_v45  ;;  %6480 = vmatmul.mubr.msk.f32.vlgmr.msra.gmra.mxu1 %vm297_vm0, %v7035_v45  ;;  %v3544_v45 = vld [vmem:[#allocation6 + $0x518] sm:$0xff] }
  0xae   : > { %2949 = vmatprep.subr.mxu0 %v2903_v7  ;;  %3020 = vmatprep.subr.mxu1 %v2905_v8  ;;  %v3556_v7 = vld [vmem:[#allocation6 + $0x578] sm:$0xff]  ;;  %v3553_v8 = vld [vmem:[#allocation6 + $0x560] sm:$0xff] }
  0xaf   : > { %2950 = vmatpush1.msra.mxu0 %v2902_v9  ;;  %3021 = vmatpush1.msra.mxu1 %v2904_v10  ;;  %v3555_v9 = vld [vmem:[#allocation6 + $0x570] sm:$0xff]  ;;  %v4213_v10 = vld [vmem:[#allocation6 + $0x688] sm:$0xff] }
  0xb0   : > { %2951 = vmatprep.subr.mxu0 %v2887_v11  ;;  %3022 = vmatprep.subr.mxu1 %v2889_v12  ;;  %v4215_v11 = vld [vmem:[#allocation6 + $0x698] sm:$0xff]  ;;  %v4212_v12 = vld [vmem:[#allocation6 + $0x680] sm:$0xff] }
  0xb1   : > { %2952 = vmatpush1.msra.mxu0 %v2886_v13  ;;  %2985 = vmatprep.mubr.f32.mxu0 %v6792_v0  ;;  %v4214_v13 = vld [vmem:[#allocation6 + $0x690] sm:$0xff] }
  0xb2   : > { %3023 = vmatpush1.msra.mxu1 %v2888_v14  ;;  %3056 = vmatprep.mubr.f32.mxu1 %v6792_v0  ;;  %v4197_v14 = vld [vmem:[#allocation6 + $0x608] sm:$0xff] }
  0xb3   : > { %6482 = vmatmul.mubr.msk.f32.vlgmr.msra.gmra.mxu0 %vm297_vm0, %v7062_v15  ;;  %6483 = vmatmul.mubr.msk.f32.vlgmr.msra.gmra.mxu1 %vm297_vm0, %v7062_v15 }
  0xb4   : > { %3091 = vmatprep.subr.mxu0 %v2907_v16  ;;  %3162 = vmatprep.subr.mxu1 %v2909_v17  ;;  %v4196_v16 = vld [vmem:[#allocation6 + $0x600] sm:$0xff]  ;;  %v4198_v17 = vld [vmem:[#allocation6 + $0x610] sm:$0xff] }
  0xb5   : > { %3092 = vmatpush1.msra.mxu0 %v2906_v18  ;;  %3163 = vmatpush1.msra.mxu1 %v2908_v19  ;;  %v7116_v18 = vld [vmem:[%s6943_s7 + $0x6] sm:$0xff] }
  0xb6   : > { %3093 = vmatprep.subr.mxu0 %v2891_v20  ;;  %3164 = vmatprep.subr.mxu1 %v2893_v21  ;;  %v4217_v19 = vld [vmem:[#allocation6 + $0x6a8] sm:$0xff]  ;;  %v4219_v20 = vld [vmem:[#allocation6 + $0x6b8] sm:$0xff]  ;;  %v4216_v21 = vld [vmem:[#allocation6 + $0x6a0] sm:$0xff] }
  0xb7   : > { %3094 = vmatpush1.msra.mxu0 %v2890_v22  ;;  %3127 = vmatprep.mubr.f32.mxu0 %v6792_v0  ;;  %v4218_v22 = vld [vmem:[#allocation6 + $0x6b0] sm:$0xff] }
  0xb8   : > { %3165 = vmatpush1.msra.mxu1 %v2892_v23  ;;  %3198 = vmatprep.mubr.f32.mxu1 %v6792_v0  ;;  %v4201_v23 = vld [vmem:[#allocation6 + $0x628] sm:$0xff] }
  0xb9   : > { %6484 = vmatmul.mubr.msk.f32.vlgmr.msra.gmra.mxu0 %vm297_vm0, %v7062_v15  ;;  %6485 = vmatmul.mubr.msk.f32.vlgmr.msra.gmra.mxu1 %vm297_vm0, %v7062_v15 }
  0xba   : > { %3233 = vmatprep.subr.mxu0 %v2911_v24  ;;  %3304 = vmatprep.subr.mxu1 %v2913_v25  ;;  %v4203_v24 = vld [vmem:[#allocation6 + $0x638] sm:$0xff]  ;;  %v4200_v25 = vld [vmem:[#allocation6 + $0x620] sm:$0xff] }
  0xbb   : > { %3234 = vmatpush1.msra.mxu0 %v2910_v26  ;;  %3305 = vmatpush1.msra.mxu1 %v2912_v27  ;;  %v4202_v26 = vld [vmem:[#allocation6 + $0x630] sm:$0xff]  ;;  %v4221_v27 = vld [vmem:[#allocation6 + $0x6c8] sm:$0xff] }
  0xbc   : > { %3235 = vmatprep.subr.mxu0 %v2895_v28  ;;  %3306 = vmatprep.subr.mxu1 %v2897_v29  ;;  %v4223_v28 = vld [vmem:[#allocation6 + $0x6d8] sm:$0xff]  ;;  %v4220_v29 = vld [vmem:[#allocation6 + $0x6c0] sm:$0xff] }
  0xbd   : > { %3236 = vmatpush1.msra.mxu0 %v2894_v30  ;;  %3269 = vmatprep.mubr.f32.mxu0 %v6792_v0  ;;  %v4222_v30 = vld [vmem:[#allocation6 + $0x6d0] sm:$0xff] }
  0xbe   : > { %3307 = vmatpush1.msra.mxu1 %v2896_v31  ;;  %3340 = vmatprep.mubr.f32.mxu1 %v6792_v0  ;;  %v4205_v31 = vld [vmem:[#allocation6 + $0x648] sm:$0xff] }
  0xbf   : > { %6486 = vmatmul.mubr.msk.f32.vlgmr.msra.gmra.mxu0 %vm297_vm0, %v7062_v15  ;;  %6487 = vmatmul.mubr.msk.f32.vlgmr.msra.gmra.mxu1 %vm297_vm0, %v7062_v15 }
  0xc0   : > { %3375 = vmatprep.subr.mxu0 %v2915_v32  ;;  %3446 = vmatprep.subr.mxu1 %v2917_v33  ;;  %v4207_v32 = vld [vmem:[#allocation6 + $0x658] sm:$0xff]  ;;  %v4204_v33 = vld [vmem:[#allocation6 + $0x640] sm:$0xff] }
  0xc1   : > { %3376 = vmatpush1.msra.mxu0 %v2914_v34  ;;  %3447 = vmatpush1.msra.mxu1 %v2916_v35  ;;  %v4206_v34 = vld [vmem:[#allocation6 + $0x650] sm:$0xff]  ;;  %v4225_v35 = vld [vmem:[#allocation6 + $0x6e8] sm:$0xff] }
  0xc2   : > { %3377 = vmatprep.subr.mxu0 %v2899_v36  ;;  %3448 = vmatprep.subr.mxu1 %v2901_v37  ;;  %v4227_v36 = vld [vmem:[#allocation6 + $0x6f8] sm:$0xff]  ;;  %v4224_v37 = vld [vmem:[#allocation6 + $0x6e0] sm:$0xff] }
  0xc3   : > { %3378 = vmatpush1.msra.mxu0 %v2898_v38  ;;  %3411 = vmatprep.mubr.f32.mxu0 %v6792_v0  ;;  %v4226_v38 = vld [vmem:[#allocation6 + $0x6f0] sm:$0xff] }
  0xc4   : > { %3449 = vmatpush1.msra.mxu1 %v2900_v39  ;;  %3482 = vmatprep.mubr.f32.mxu1 %v6792_v0  ;;  %v4209_v39 = vld [vmem:[#allocation6 + $0x668] sm:$0xff] }
  0xc5   : > { %6488 = vmatmul.mubr.msk.f32.vlgmr.msra.gmra.mxu0 %vm297_vm0, %v7062_v15  ;;  %6489 = vmatmul.mubr.msk.f32.vlgmr.msra.gmra.mxu1 %vm297_vm0, %v7062_v15  ;;  %v4199_v15 = vld [vmem:[#allocation6 + $0x618] sm:$0xff] }
  0xc6   : > { %3604 = vmatprep.subr.mxu0 %v3558_v40  ;;  %3675 = vmatprep.subr.mxu1 %v3560_v41  ;;  %v4211_v40 = vld [vmem:[#allocation6 + $0x678] sm:$0xff]  ;;  %v4208_v41 = vld [vmem:[#allocation6 + $0x660] sm:$0xff] }
  0xc7   : > { %3605 = vmatpush1.msra.mxu0 %v3557_v42  ;;  %3676 = vmatpush1.msra.mxu1 %v3559_v43  ;;  %v4210_v42 = vld [vmem:[#allocation6 + $0x670] sm:$0xff]  ;;  %v4868_v43 = vld [vmem:[#allocation6 + $0x788] sm:$0xff] }
  0xc8   : > { %3606 = vmatprep.subr.mxu0 %v3542_v44  ;;  %3677 = vmatprep.subr.mxu1 %v3544_v45  ;;  %v4870_v44 = vld [vmem:[#allocation6 + $0x798] sm:$0xff]  ;;  %v4867_v45 = vld [vmem:[#allocation6 + $0x780] sm:$0xff] }
  0xc9   : > { %3607 = vmatpush1.msra.mxu0 %v3541_v46  ;;  %3640 = vmatprep.mubr.f32.mxu0 %v6792_v0  ;;  %v4869_v46 = vld [vmem:[#allocation6 + $0x790] sm:$0xff] }
  0xca   : > { %3678 = vmatpush1.msra.mxu1 %v3543_v47  ;;  %3711 = vmatprep.mubr.f32.mxu1 %v6792_v0  ;;  %v4852_v47 = vld [vmem:[#allocation6 + $0x708] sm:$0xff] }
  0xcb   : > { %6491 = vmatmul.mubr.msk.f32.vlgmr.msra.gmra.mxu0 %vm297_vm0, %v7089_v48  ;;  %6492 = vmatmul.mubr.msk.f32.vlgmr.msra.gmra.mxu1 %vm297_vm0, %v7089_v48 }
  0xcc   : > { %3746 = vmatprep.subr.mxu0 %v3562_v49  ;;  %3817 = vmatprep.subr.mxu1 %v3564_v50  ;;  %v4851_v49 = vld [vmem:[#allocation6 + $0x700] sm:$0xff]  ;;  %v4853_v50 = vld [vmem:[#allocation6 + $0x710] sm:$0xff] }
  0xcd   : > { %3747 = vmatpush1.msra.mxu0 %v3561_v51  ;;  %3818 = vmatpush1.msra.mxu1 %v3563_v52  ;;  %v7143_v51 = vld [vmem:[%s6943_s7 + $0x7] sm:$0xff] }
  0xce   : > { %3748 = vmatprep.subr.mxu0 %v3546_v53  ;;  %3819 = vmatprep.subr.mxu1 %v3548_v54  ;;  %v4872_v52 = vld [vmem:[#allocation6 + $0x7a8] sm:$0xff]  ;;  %v4874_v53 = vld [vmem:[#allocation6 + $0x7b8] sm:$0xff]  ;;  %v4871_v54 = vld [vmem:[#allocation6 + $0x7a0] sm:$0xff] }
  0xcf   : > { %3749 = vmatpush1.msra.mxu0 %v3545_v55  ;;  %3782 = vmatprep.mubr.f32.mxu0 %v6792_v0  ;;  %v4873_v55 = vld [vmem:[#allocation6 + $0x7b0] sm:$0xff] }
  0xd0   : > { %3820 = vmatpush1.msra.mxu1 %v3547_v56  ;;  %3853 = vmatprep.mubr.f32.mxu1 %v6792_v0  ;;  %v4856_v56 = vld [vmem:[#allocation6 + $0x728] sm:$0xff] }
  0xd1   : > { %6493 = vmatmul.mubr.msk.f32.vlgmr.msra.gmra.mxu0 %vm297_vm0, %v7089_v48  ;;  %6494 = vmatmul.mubr.msk.f32.vlgmr.msra.gmra.mxu1 %vm297_vm0, %v7089_v48 }
  0xd2   : > { %3888 = vmatprep.subr.mxu0 %v3566_v57  ;;  %3959 = vmatprep.subr.mxu1 %v3568_v58  ;;  %v4858_v57 = vld [vmem:[#allocation6 + $0x738] sm:$0xff]  ;;  %v4855_v58 = vld [vmem:[#allocation6 + $0x720] sm:$0xff] }
  0xd3   : > { %3889 = vmatpush1.msra.mxu0 %v3565_v59  ;;  %3960 = vmatpush1.msra.mxu1 %v3567_v60  ;;  %v4857_v59 = vld [vmem:[#allocation6 + $0x730] sm:$0xff]  ;;  %v4876_v60 = vld [vmem:[#allocation6 + $0x7c8] sm:$0xff] }
  0xd4   : > { %3890 = vmatprep.subr.mxu0 %v3550_v61  ;;  %3961 = vmatprep.subr.mxu1 %v3552_v62  ;;  %v4878_v61 = vld [vmem:[#allocation6 + $0x7d8] sm:$0xff]  ;;  %v4875_v62 = vld [vmem:[#allocation6 + $0x7c0] sm:$0xff] }
  0xd5   : > { %3891 = vmatpush1.msra.mxu0 %v3549_v63  ;;  %3924 = vmatprep.mubr.f32.mxu0 %v6792_v0  ;;  %v4877_v63 = vld [vmem:[#allocation6 + $0x7d0] sm:$0xff] }
  0xd6   : > { %3962 = vmatpush1.msra.mxu1 %v3551_v1  ;;  %3995 = vmatprep.mubr.f32.mxu1 %v6792_v0  ;;  %v4860_v1 = vld [vmem:[#allocation6 + $0x748] sm:$0xff] }
  0xd7   : > { %6495 = vmatmul.mubr.msk.f32.vlgmr.msra.gmra.mxu0 %vm297_vm0, %v7089_v48  ;;  %6496 = vmatmul.mubr.msk.f32.vlgmr.msra.gmra.mxu1 %vm297_vm0, %v7089_v48 }
  0xd8   : > { %4030 = vmatprep.subr.mxu0 %v3570_v2  ;;  %4101 = vmatprep.subr.mxu1 %v3572_v3  ;;  %v4862_v2 = vld [vmem:[#allocation6 + $0x758] sm:$0xff]  ;;  %v4859_v3 = vld [vmem:[#allocation6 + $0x740] sm:$0xff] }
  0xd9   : > { %4031 = vmatpush1.msra.mxu0 %v3569_v4  ;;  %4102 = vmatpush1.msra.mxu1 %v3571_v5  ;;  %v4861_v4 = vld [vmem:[#allocation6 + $0x750] sm:$0xff]  ;;  %v4880_v5 = vld [vmem:[#allocation6 + $0x7e8] sm:$0xff] }
  0xda   : > { %4032 = vmatprep.subr.mxu0 %v3554_v6  ;;  %4103 = vmatprep.subr.mxu1 %v3556_v7  ;;  %v4882_v6 = vld [vmem:[#allocation6 + $0x7f8] sm:$0xff]  ;;  %v4879_v7 = vld [vmem:[#allocation6 + $0x7e0] sm:$0xff] }
  0xdb   : > { %4033 = vmatpush1.msra.mxu0 %v3553_v8  ;;  %4066 = vmatprep.mubr.f32.mxu0 %v6792_v0  ;;  %v4881_v8 = vld [vmem:[#allocation6 + $0x7f0] sm:$0xff] }
  0xdc   : > { %4104 = vmatpush1.msra.mxu1 %v3555_v9  ;;  %4137 = vmatprep.mubr.f32.mxu1 %v6792_v0  ;;  %v4864_v9 = vld [vmem:[#allocation6 + $0x768] sm:$0xff] }
  0xdd   : > { %6497 = vmatmul.mubr.msk.f32.vlgmr.msra.gmra.mxu0 %vm297_vm0, %v7089_v48  ;;  %6498 = vmatmul.mubr.msk.f32.vlgmr.msra.gmra.mxu1 %vm297_vm0, %v7089_v48  ;;  %v4854_v48 = vld [vmem:[#allocation6 + $0x718] sm:$0xff] }
  0xde   : > { %4259 = vmatprep.subr.mxu0 %v4213_v10  ;;  %4330 = vmatprep.subr.mxu1 %v4215_v11  ;;  %v4866_v10 = vld [vmem:[#allocation6 + $0x778] sm:$0xff]  ;;  %v4863_v11 = vld [vmem:[#allocation6 + $0x760] sm:$0xff] }
  0xdf   : > { %4260 = vmatpush1.msra.mxu0 %v4212_v12  ;;  %4331 = vmatpush1.msra.mxu1 %v4214_v13  ;;  %v4865_v12 = vld [vmem:[#allocation6 + $0x770] sm:$0xff]  ;;  %v5523_v13 = vld [vmem:[#allocation6 + $0x888] sm:$0xff] }
  0xe0   : > { %4261 = vmatprep.subr.mxu0 %v4197_v14  ;;  %4332 = vmatprep.subr.mxu1 %v4199_v15  ;;  %v5525_v14 = vld [vmem:[#allocation6 + $0x898] sm:$0xff]  ;;  %v5522_v15 = vld [vmem:[#allocation6 + $0x880] sm:$0xff] }
  0xe1   : > { %4262 = vmatpush1.msra.mxu0 %v4196_v16  ;;  %4295 = vmatprep.mubr.f32.mxu0 %v6792_v0  ;;  %v5524_v16 = vld [vmem:[#allocation6 + $0x890] sm:$0xff] }
  0xe2   : > { %4333 = vmatpush1.msra.mxu1 %v4198_v17  ;;  %4366 = vmatprep.mubr.f32.mxu1 %v6792_v0  ;;  %v5507_v17 = vld [vmem:[#allocation6 + $0x808] sm:$0xff] }
  0xe3   : > { %6500 = vmatmul.mubr.msk.f32.vlgmr.msra.gmra.mxu0 %vm297_vm0, %v7116_v18  ;;  %6501 = vmatmul.mubr.msk.f32.vlgmr.msra.gmra.mxu1 %vm297_vm0, %v7116_v18 }
  0xe4   : > { %4401 = vmatprep.subr.mxu0 %v4217_v19  ;;  %4472 = vmatprep.subr.mxu1 %v4219_v20  ;;  %v5506_v19 = vld [vmem:[#allocation6 + $0x800] sm:$0xff]  ;;  %v5508_v20 = vld [vmem:[#allocation6 + $0x810] sm:$0xff] }
  0xe5   : > { %4402 = vmatpush1.msra.mxu0 %v4216_v21  ;;  %4473 = vmatpush1.msra.mxu1 %v4218_v22  ;;  %v7170_v21 = vld [vmem:[%s6943_s7 + $0x8] sm:$0xff] }
  0xe6   : > { %4403 = vmatprep.subr.mxu0 %v4201_v23  ;;  %4474 = vmatprep.subr.mxu1 %v4203_v24  ;;  %v5527_v22 = vld [vmem:[#allocation6 + $0x8a8] sm:$0xff]  ;;  %v5529_v23 = vld [vmem:[#allocation6 + $0x8b8] sm:$0xff]  ;;  %v5526_v24 = vld [vmem:[#allocation6 + $0x8a0] sm:$0xff] }
  0xe7   : > { %4404 = vmatpush1.msra.mxu0 %v4200_v25  ;;  %4437 = vmatprep.mubr.f32.mxu0 %v6792_v0  ;;  %v5528_v25 = vld [vmem:[#allocation6 + $0x8b0] sm:$0xff] }
  0xe8   : > { %4475 = vmatpush1.msra.mxu1 %v4202_v26  ;;  %4508 = vmatprep.mubr.f32.mxu1 %v6792_v0  ;;  %v5511_v26 = vld [vmem:[#allocation6 + $0x828] sm:$0xff] }
  0xe9   : > { %6502 = vmatmul.mubr.msk.f32.vlgmr.msra.gmra.mxu0 %vm297_vm0, %v7116_v18  ;;  %6503 = vmatmul.mubr.msk.f32.vlgmr.msra.gmra.mxu1 %vm297_vm0, %v7116_v18 }
  0xea   : > { %4543 = vmatprep.subr.mxu0 %v4221_v27  ;;  %4614 = vmatprep.subr.mxu1 %v4223_v28  ;;  %v5513_v27 = vld [vmem:[#allocation6 + $0x838] sm:$0xff] }
  0xeb   : > { %4544 = vmatpush1.msra.mxu0 %v4220_v29  ;;  %4615 = vmatpush1.msra.mxu1 %v4222_v30  ;;  %v5510_v30 = vld [vmem:[#allocation6 + $0x820] sm:$0xff] }
  0xec   : > { %4545 = vmatprep.subr.mxu0 %v4205_v31  ;;  %4616 = vmatprep.subr.mxu1 %v4207_v32  ;;  %v5512_v31 = vld [vmem:[#allocation6 + $0x830] sm:$0xff] }
  0xed   : > { %4546 = vmatpush1.msra.mxu0 %v4204_v33  ;;  %4579 = vmatprep.mubr.f32.mxu0 %v6792_v0 }
  0xee   : > { %4617 = vmatpush1.msra.mxu1 %v4206_v34  ;;  %4650 = vmatprep.mubr.f32.mxu1 %v6792_v0  ;;  %v5531_v34 = vld [vmem:[#allocation6 + $0x8c8] sm:$0xff] }
  0xef   : > { %6504 = vmatmul.mubr.msk.f32.vlgmr.msra.gmra.mxu0 %vm297_vm0, %v7116_v18  ;;  %6505 = vmatmul.mubr.msk.f32.vlgmr.msra.gmra.mxu1 %vm297_vm0, %v7116_v18 }
  0xf0   : > { %4685 = vmatprep.subr.mxu0 %v4225_v35  ;;  %4756 = vmatprep.subr.mxu1 %v4227_v36  ;;  %v5533_v35 = vld [vmem:[#allocation6 + $0x8d8] sm:$0xff]  ;;  %v5530_v36 = vld [vmem:[#allocation6 + $0x8c0] sm:$0xff] }
  0xf1   : > { %4686 = vmatpush1.msra.mxu0 %v4224_v37  ;;  %4757 = vmatpush1.msra.mxu1 %v4226_v38  ;;  %v5532_v37 = vld [vmem:[#allocation6 + $0x8d0] sm:$0xff]  ;;  %v5515_v38 = vld [vmem:[#allocation6 + $0x848] sm:$0xff] }
  0xf2   : > { %4687 = vmatprep.subr.mxu0 %v4209_v39  ;;  %4758 = vmatprep.subr.mxu1 %v4211_v40  ;;  %v5517_v39 = vld [vmem:[#allocation6 + $0x858] sm:$0xff] }
  0xf3   : > { %4688 = vmatpush1.msra.mxu0 %v4208_v41  ;;  %4721 = vmatprep.mubr.f32.mxu0 %v6792_v0 }
  0xf4   : > { %4759 = vmatpush1.msra.mxu1 %v4210_v42  ;;  %4792 = vmatprep.mubr.f32.mxu1 %v6792_v0  ;;  %v5514_v42 = vld [vmem:[#allocation6 + $0x840] sm:$0xff] }
  0xf5   : > { %6506 = vmatmul.mubr.msk.f32.vlgmr.msra.gmra.mxu0 %vm297_vm0, %v7116_v18  ;;  %6507 = vmatmul.mubr.msk.f32.vlgmr.msra.gmra.mxu1 %vm297_vm0, %v7116_v18  ;;  %v5509_v18 = vld [vmem:[#allocation6 + $0x818] sm:$0xff] }
  0xf6   : > { %4914 = vmatprep.subr.mxu0 %v4868_v43  ;;  %4985 = vmatprep.subr.mxu1 %v4870_v44  ;;  %v5516_v43 = vld [vmem:[#allocation6 + $0x850] sm:$0xff] }
  0xf7   : > { %4915 = vmatpush1.msra.mxu0 %v4867_v45  ;;  %4986 = vmatpush1.msra.mxu1 %v4869_v46  ;;  %v5535_v46 = vld [vmem:[#allocation6 + $0x8e8] sm:$0xff] }
  0xf8   : > { %4916 = vmatprep.subr.mxu0 %v4852_v47  ;;  %4987 = vmatprep.subr.mxu1 %v4854_v48  ;;  %v5537_v47 = vld [vmem:[#allocation6 + $0x8f8] sm:$0xff]  ;;  %v5534_v48 = vld [vmem:[#allocation6 + $0x8e0] sm:$0xff] }
  0xf9   : > { %4917 = vmatpush1.msra.mxu0 %v4851_v49  ;;  %4950 = vmatprep.mubr.f32.mxu0 %v6792_v0  ;;  %v5536_v49 = vld [vmem:[#allocation6 + $0x8f0] sm:$0xff] }
  0xfa   : > { %4988 = vmatpush1.msra.mxu1 %v4853_v50  ;;  %5021 = vmatprep.mubr.f32.mxu1 %v6792_v0  ;;  %v5519_v50 = vld [vmem:[#allocation6 + $0x868] sm:$0xff] }
  0xfb   : > { %6509 = vmatmul.mubr.msk.f32.vlgmr.msra.gmra.mxu0 %vm297_vm0, %v7143_v51  ;;  %6510 = vmatmul.mubr.msk.f32.vlgmr.msra.gmra.mxu1 %vm297_vm0, %v7143_v51 }
  0xfc   : > { %5056 = vmatprep.subr.mxu0 %v4872_v52  ;;  %5127 = vmatprep.subr.mxu1 %v4874_v53 }
  0xfd   : > { %5057 = vmatpush1.msra.mxu0 %v4871_v54  ;;  %5128 = vmatpush1.msra.mxu1 %v4873_v55  ;;  %v5518_v54 = vld [vmem:[#allocation6 + $0x860] sm:$0xff]  ;;  %v5520_v55 = vld [vmem:[#allocation6 + $0x870] sm:$0xff] }
  0xfe   : > { %5058 = vmatprep.subr.mxu0 %v4856_v56  ;;  %5129 = vmatprep.subr.mxu1 %v4858_v57 }
  0xff   : > { %5059 = vmatpush1.msra.mxu0 %v4855_v58  ;;  %5092 = vmatprep.mubr.f32.mxu0 %v6792_v0 }
 0x100   : > { %5130 = vmatpush1.msra.mxu1 %v4857_v59  ;;  %5163 = vmatprep.mubr.f32.mxu1 %v6792_v0 }
 0x101   : > { %6511 = vmatmul.mubr.msk.f32.vlgmr.msra.gmra.mxu0 %vm297_vm0, %v7143_v51  ;;  %6512 = vmatmul.mubr.msk.f32.vlgmr.msra.gmra.mxu1 %vm297_vm0, %v7143_v51 }
 0x102   : > { %5198 = vmatprep.subr.mxu0 %v4876_v60  ;;  %5269 = vmatprep.subr.mxu1 %v4878_v61 }
 0x103   : > { %5199 = vmatpush1.msra.mxu0 %v4875_v62  ;;  %5270 = vmatpush1.msra.mxu1 %v4877_v63 }
 0x104   : > { %5200 = vmatprep.subr.mxu0 %v4860_v1  ;;  %5271 = vmatprep.subr.mxu1 %v4862_v2 }
 0x105   : > { %5201 = vmatpush1.msra.mxu0 %v4859_v3  ;;  %5234 = vmatprep.mubr.f32.mxu0 %v6792_v0 }
 0x106   : > { %5272 = vmatpush1.msra.mxu1 %v4861_v4  ;;  %5305 = vmatprep.mubr.f32.mxu1 %v6792_v0 }
 0x107   : > { %6513 = vmatmul.mubr.msk.f32.vlgmr.msra.gmra.mxu0 %vm297_vm0, %v7143_v51  ;;  %6514 = vmatmul.mubr.msk.f32.vlgmr.msra.gmra.mxu1 %vm297_vm0, %v7143_v51 }
 0x108   : > { %5340 = vmatprep.subr.mxu0 %v4880_v5  ;;  %5411 = vmatprep.subr.mxu1 %v4882_v6 }
 0x109   : > { %5341 = vmatpush1.msra.mxu0 %v4879_v7  ;;  %5412 = vmatpush1.msra.mxu1 %v4881_v8 }
 0x10a   : > { %5342 = vmatprep.subr.mxu0 %v4864_v9  ;;  %5413 = vmatprep.subr.mxu1 %v4866_v10 }
 0x10b   : > { %5343 = vmatpush1.msra.mxu0 %v4863_v11  ;;  %5376 = vmatprep.mubr.f32.mxu0 %v6792_v0 }
 0x10c   : > { %5414 = vmatpush1.msra.mxu1 %v4865_v12  ;;  %5447 = vmatprep.mubr.f32.mxu1 %v6792_v0 }
 0x10d   : > { %6515 = vmatmul.mubr.msk.f32.vlgmr.msra.gmra.mxu0 %vm297_vm0, %v7143_v51  ;;  %6516 = vmatmul.mubr.msk.f32.vlgmr.msra.gmra.mxu1 %vm297_vm0, %v7143_v51  ;;  %v5521_v51 = vld [vmem:[#allocation6 + $0x878] sm:$0xff] }
 0x10e   : > { %5569 = vmatprep.subr.mxu0 %v5523_v13  ;;  %5640 = vmatprep.subr.mxu1 %v5525_v14 }
 0x10f   : > { %5570 = vmatpush1.msra.mxu0 %v5522_v15  ;;  %5641 = vmatpush1.msra.mxu1 %v5524_v16 }
 0x110   : > { %5571 = vmatprep.subr.mxu0 %v5507_v17  ;;  %5642 = vmatprep.subr.mxu1 %v5509_v18 }
 0x111   : > { %5572 = vmatpush1.msra.mxu0 %v5506_v19  ;;  %5605 = vmatprep.mubr.f32.mxu0 %v6792_v0 }
 0x112   : > { %5643 = vmatpush1.msra.mxu1 %v5508_v20  ;;  %5676 = vmatprep.mubr.f32.mxu1 %v6792_v0 }
 0x113   : > { %6518 = vmatmul.mubr.msk.f32.vlgmr.msra.gmra.mxu0 %vm297_vm0, %v7170_v21  ;;  %6519 = vmatmul.mubr.msk.f32.vlgmr.msra.gmra.mxu1 %vm297_vm0, %v7170_v21  ;;  %v7178_v28 = vpop.f32.mrf.mxu0  ;;  %v7180_v29 = vpop.f32.mrf.mxu1 }
 0x114   : > { %5711 = vmatprep.subr.mxu0 %v5527_v22  ;;  %5782 = vmatprep.subr.mxu1 %v5529_v23 }
 0x115   : > { %5712 = vmatpush1.msra.mxu0 %v5526_v24  ;;  %5783 = vmatpush1.msra.mxu1 %v5528_v25  ;;  %v7182_v32 = vpop.f32.mrf.mxu0  ;;  %v7184_v33 = vpop.f32.mrf.mxu1 }
 0x116   : > { %5713 = vmatprep.subr.mxu0 %v5511_v26  ;;  %5784 = vmatprep.subr.mxu1 %v5513_v27 }
 0x117   : > { %5714 = vmatpush1.msra.mxu0 %v5510_v30  ;;  %5747 = vmatprep.mubr.f32.mxu0 %v6792_v0 }
 0x118   : > { %5785 = vmatpush1.msra.mxu1 %v5512_v31  ;;  %5818 = vmatprep.mubr.f32.mxu1 %v6792_v0 }
 0x119   : > { %6520 = vmatmul.mubr.msk.f32.vlgmr.msra.gmra.mxu0 %vm297_vm0, %v7170_v21  ;;  %6521 = vmatmul.mubr.msk.f32.vlgmr.msra.gmra.mxu1 %vm297_vm0, %v7170_v21  ;;  %v509_v40 = vpop.f32.mrf.mxu0  ;;  %v580_v41 = vpop.f32.mrf.mxu1 }
 0x11a   : > { %5853 = vmatprep.subr.mxu0 %v5531_v34  ;;  %5924 = vmatprep.subr.mxu1 %v5533_v35 }
 0x11b   : > { %5854 = vmatpush1.msra.mxu0 %v5530_v36  ;;  %5925 = vmatpush1.msra.mxu1 %v5532_v37  ;;  %v511_v44 = vpop.f32.mrf.mxu0  ;;  %v582_v45 = vpop.f32.mrf.mxu1 }
 0x11c   : > { %5855 = vmatprep.subr.mxu0 %v5515_v38  ;;  %5926 = vmatprep.subr.mxu1 %v5517_v39 }
 0x11d   : > { %5856 = vmatpush1.msra.mxu0 %v5514_v42  ;;  %5889 = vmatprep.mubr.f32.mxu0 %v6792_v0 }
 0x11e   : > { %5927 = vmatpush1.msra.mxu1 %v5516_v43  ;;  %5960 = vmatprep.mubr.f32.mxu1 %v6792_v0 }
 0x11f   : > { %6522 = vmatmul.mubr.msk.f32.vlgmr.msra.gmra.mxu0 %vm297_vm0, %v7170_v21  ;;  %6523 = vmatmul.mubr.msk.f32.vlgmr.msra.gmra.mxu1 %vm297_vm0, %v7170_v21  ;;  %v651_v52 = vpop.f32.mrf.mxu0  ;;  %v722_v53 = vpop.f32.mrf.mxu1 }
 0x120   : > { %5995 = vmatprep.subr.mxu0 %v5535_v46  ;;  %6066 = vmatprep.subr.mxu1 %v5537_v47 }
 0x121   : > { %5996 = vmatpush1.msra.mxu0 %v5534_v48  ;;  %6067 = vmatpush1.msra.mxu1 %v5536_v49  ;;  %v653_v56 = vpop.f32.mrf.mxu0  ;;  %v724_v57 = vpop.f32.mrf.mxu1 }
 0x122   : > { %5997 = vmatprep.subr.mxu0 %v5519_v50  ;;  %6068 = vmatprep.subr.mxu1 %v5521_v51 }
 0x123   : > { %5998 = vmatpush1.msra.mxu0 %v5518_v54  ;;  %6031 = vmatprep.mubr.f32.mxu0 %v6792_v0 }
 0x124   : > { %6069 = vmatpush1.msra.mxu1 %v5520_v55  ;;  %6102 = vmatprep.mubr.f32.mxu1 %v6792_v0 }
 0x125   : > { %6524 = vmatmul.mubr.msk.f32.vlgmr.msra.gmra.mxu0 %vm297_vm0, %v7170_v21  ;;  %6525 = vmatmul.mubr.msk.f32.vlgmr.msra.gmra.mxu1 %vm297_vm0, %v7170_v21  ;;  %v793_v58 = vpop.f32.mrf.mxu0  ;;  %v864_v59 = vpop.f32.mrf.mxu1 }
 0x127   : > { %v795_v60 = vpop.f32.mrf.mxu0  ;;  %v866_v61 = vpop.f32.mrf.mxu1 }
 0x12b   : > { %v1022_v62 = vpop.f32.mrf.mxu0  ;;  %v1093_v63 = vpop.f32.mrf.mxu1 }
 0x12c   : > { %v1524_v1 = vadd.f32 %v1022_v62, %v7178_v28  ;;  %v1526_v2 = vadd.f32 %v1093_v63, %v7180_v29 }
 0x12d   : > { %v1024_v3 = vpop.f32.mrf.mxu0  ;;  %v1095_v4 = vpop.f32.mrf.mxu1 }
 0x12e   : > { %v1525_v0 = vadd.f32 %v1024_v3, %v7182_v32  ;;  %v1527_v5 = vadd.f32 %v1095_v4, %v7184_v33 }
 0x131   : > { %v1164_v6 = vpop.f32.mrf.mxu0  ;;  %v1235_v7 = vpop.f32.mrf.mxu1 }
 0x132   : > { %v1528_v8 = vadd.f32 %v1164_v6, %v509_v40  ;;  %v1530_v9 = vadd.f32 %v1235_v7, %v580_v41 }
 0x133   : > { %v1166_v10 = vpop.f32.mrf.mxu0  ;;  %v1237_v11 = vpop.f32.mrf.mxu1 }
 0x134   : > { %v1529_v12 = vadd.f32 %v1166_v10, %v511_v44  ;;  %v1531_v13 = vadd.f32 %v1237_v11, %v582_v45 }
 0x137   : > { %v1306_v14 = vpop.f32.mrf.mxu0  ;;  %v1377_v15 = vpop.f32.mrf.mxu1 }
 0x138   : > { %v1532_v16 = vadd.f32 %v1306_v14, %v651_v52  ;;  %v1534_v17 = vadd.f32 %v1377_v15, %v722_v53 }
 0x139   : > { %v1308_v18 = vpop.f32.mrf.mxu0  ;;  %v1379_v19 = vpop.f32.mrf.mxu1 }
 0x13a   : > { %v1533_v20 = vadd.f32 %v1308_v18, %v653_v56  ;;  %v1535_v21 = vadd.f32 %v1379_v19, %v724_v57 }
 0x13d   : > { %v1448_v22 = vpop.f32.mrf.mxu0  ;;  %v1519_v23 = vpop.f32.mrf.mxu1 }
 0x13e   : > { %v1536_v24 = vadd.f32 %v1448_v22, %v793_v58  ;;  %v1538_v25 = vadd.f32 %v1519_v23, %v864_v59 }
 0x13f   : > { %v1450_v26 = vpop.f32.mrf.mxu0  ;;  %v1521_v27 = vpop.f32.mrf.mxu1 }
 0x140   : > { %v1537_v28 = vadd.f32 %v1450_v26, %v795_v60  ;;  %v1539_v29 = vadd.f32 %v1521_v27, %v866_v61 }
 0x143   : > { %v1677_v30 = vpop.f32.mrf.mxu0  ;;  %v1748_v31 = vpop.f32.mrf.mxu1 }
 0x144   : > { %v2179_v32 = vadd.f32 %v1677_v30, %v1524_v1  ;;  %v2181_v33 = vadd.f32 %v1748_v31, %v1526_v2 }
 0x145   : > { %v1679_v34 = vpop.f32.mrf.mxu0  ;;  %v1750_v35 = vpop.f32.mrf.mxu1 }
 0x146   : > { %v2180_v36 = vadd.f32 %v1679_v34, %v1525_v0  ;;  %v2182_v37 = vadd.f32 %v1750_v35, %v1527_v5 }
 0x149   : > { %v1819_v38 = vpop.f32.mrf.mxu0  ;;  %v1890_v39 = vpop.f32.mrf.mxu1 }
 0x14a   : > { %v2183_v40 = vadd.f32 %v1819_v38, %v1528_v8  ;;  %v2185_v41 = vadd.f32 %v1890_v39, %v1530_v9 }
 0x14b   : > { %v1821_v42 = vpop.f32.mrf.mxu0  ;;  %v1892_v43 = vpop.f32.mrf.mxu1 }
 0x14c   : > { %v2184_v44 = vadd.f32 %v1821_v42, %v1529_v12  ;;  %v2186_v45 = vadd.f32 %v1892_v43, %v1531_v13 }
 0x14f   : > { %v1961_v46 = vpop.f32.mrf.mxu0  ;;  %v2032_v47 = vpop.f32.mrf.mxu1 }
 0x150   : > { %v2187_v48 = vadd.f32 %v1961_v46, %v1532_v16  ;;  %v2189_v49 = vadd.f32 %v2032_v47, %v1534_v17 }
 0x151   : > { %v1963_v50 = vpop.f32.mrf.mxu0  ;;  %v2034_v51 = vpop.f32.mrf.mxu1 }
 0x152   : > { %v2188_v52 = vadd.f32 %v1963_v50, %v1533_v20  ;;  %v2190_v53 = vadd.f32 %v2034_v51, %v1535_v21 }
 0x155   : > { %v2103_v54 = vpop.f32.mrf.mxu0  ;;  %v2174_v55 = vpop.f32.mrf.mxu1 }
 0x156   : > { %v2191_v56 = vadd.f32 %v2103_v54, %v1536_v24  ;;  %v2193_v57 = vadd.f32 %v2174_v55, %v1538_v25 }
 0x157   : > { %v2105_v58 = vpop.f32.mrf.mxu0  ;;  %v2176_v59 = vpop.f32.mrf.mxu1 }
 0x158   : > { %v2192_v60 = vadd.f32 %v2105_v58, %v1537_v28  ;;  %v2194_v61 = vadd.f32 %v2176_v59, %v1539_v29 }
 0x15b   : > { %v2332_v62 = vpop.f32.mrf.mxu0  ;;  %v2403_v63 = vpop.f32.mrf.mxu1 }
 0x15c   : > { %v7208_v1 = vadd.f32 %v2332_v62, %v2179_v32  ;;  %v7210_v2 = vadd.f32 %v2403_v63, %v2181_v33 }
 0x15d   : > { %v2334_v3 = vpop.f32.mrf.mxu0  ;;  %v2405_v4 = vpop.f32.mrf.mxu1 }
 0x15e   : > { %v7212_v0 = vadd.f32 %v2334_v3, %v2180_v36  ;;  %v7214_v5 = vadd.f32 %v2405_v4, %v2182_v37 }
 0x161   : > { %v2474_v6 = vpop.f32.mrf.mxu0  ;;  %v2545_v7 = vpop.f32.mrf.mxu1 }
 0x162   : > { %v7216_v8 = vadd.f32 %v2474_v6, %v2183_v40  ;;  %v7218_v9 = vadd.f32 %v2545_v7, %v2185_v41 }
 0x163   : > { %v2476_v10 = vpop.f32.mrf.mxu0  ;;  %v2547_v11 = vpop.f32.mrf.mxu1 }
 0x164   : > { %v7220_v12 = vadd.f32 %v2476_v10, %v2184_v44  ;;  %v7222_v13 = vadd.f32 %v2547_v11, %v2186_v45 }
 0x167   : > { %v2616_v14 = vpop.f32.mrf.mxu0  ;;  %v2687_v15 = vpop.f32.mrf.mxu1 }
 0x168   : > { %v7224_v16 = vadd.f32 %v2616_v14, %v2187_v48  ;;  %v7226_v17 = vadd.f32 %v2687_v15, %v2189_v49 }
 0x169   : > { %v2618_v18 = vpop.f32.mrf.mxu0  ;;  %v2689_v19 = vpop.f32.mrf.mxu1 }
 0x16a   : > { %v7228_v20 = vadd.f32 %v2618_v18, %v2188_v52  ;;  %v7230_v21 = vadd.f32 %v2689_v19, %v2190_v53 }
 0x16d   : > { %v2758_v22 = vpop.f32.mrf.mxu0  ;;  %v2829_v23 = vpop.f32.mrf.mxu1 }
 0x16e   : > { %v7232_v24 = vadd.f32 %v2758_v22, %v2191_v56  ;;  %v7234_v25 = vadd.f32 %v2829_v23, %v2193_v57 }
 0x16f   : > { %v2760_v26 = vpop.f32.mrf.mxu0  ;;  %v2831_v27 = vpop.f32.mrf.mxu1 }
 0x170   : > { %v7236_v28 = vadd.f32 %v2760_v26, %v2192_v60  ;;  %v7238_v29 = vadd.f32 %v2831_v27, %v2194_v61 }
 0x173   : > { %v7240_v30 = vpop.f32.mrf.mxu0  ;;  %v7242_v31 = vpop.f32.mrf.mxu1 }
 0x175   : > { %v7244_v32 = vpop.f32.mrf.mxu0  ;;  %v7246_v33 = vpop.f32.mrf.mxu1 }
 0x179   : > { %v7248_v34 = vpop.f32.mrf.mxu0  ;;  %v7250_v35 = vpop.f32.mrf.mxu1 }
 0x17b   : > { %v7252_v36 = vpop.f32.mrf.mxu0  ;;  %v7254_v37 = vpop.f32.mrf.mxu1 }
 0x17f   : > { %v7256_v38 = vpop.f32.mrf.mxu0  ;;  %v7258_v39 = vpop.f32.mrf.mxu1 }
 0x181   : > { %v7260_v40 = vpop.f32.mrf.mxu0  ;;  %v7262_v41 = vpop.f32.mrf.mxu1 }
 0x185   : > { %v7264_v42 = vpop.f32.mrf.mxu0  ;;  %v7266_v43 = vpop.f32.mrf.mxu1 }
 0x187   : > { %v7268_v44 = vpop.f32.mrf.mxu0  ;;  %v7270_v45 = vpop.f32.mrf.mxu1 }
 0x18b   : > { %v7272_v46 = vpop.f32.mrf.mxu0  ;;  %v7274_v47 = vpop.f32.mrf.mxu1 }
 0x18d   : > { %v7276_v48 = vpop.f32.mrf.mxu0  ;;  %v7278_v49 = vpop.f32.mrf.mxu1 }
 0x191   : > { %v7280_v50 = vpop.f32.mrf.mxu0  ;;  %v7282_v51 = vpop.f32.mrf.mxu1 }
 0x192   : > { %7607 = vst [vmem:[#allocation13_spill] sm:$0xff] %v7282_v51 }
 0x193   : > { %v7284_v52 = vpop.f32.mrf.mxu0  ;;  %v7286_v53 = vpop.f32.mrf.mxu1 }
 0x194   : > { %7608 = vst [vmem:[#allocation14_spill] sm:$0xff] %v7284_v52  ;;  %7609 = vst [vmem:[#allocation15_spill] sm:$0xff] %v7286_v53 }
 0x197   : > { %v7288_v54 = vpop.f32.mrf.mxu0  ;;  %v7290_v55 = vpop.f32.mrf.mxu1 }
 0x198   : > { %7610 = vst [vmem:[#allocation16_spill] sm:$0xff] %v7288_v54  ;;  %7611 = vst [vmem:[#allocation17_spill] sm:$0xff] %v7290_v55 }
 0x199   : > { %v7292_v56 = vpop.f32.mrf.mxu0  ;;  %v7294_v57 = vpop.f32.mrf.mxu1 }
 0x19a   : > { %7612 = vst [vmem:[#allocation18_spill] sm:$0xff] %v7292_v56  ;;  %7613 = vst [vmem:[#allocation19_spill] sm:$0xff] %v7294_v57  ;;  %v6157_v57 = vld [vmem:[#allocation8] sm:$0xff] }
 0x19d   : > { %v7296_v58 = vpop.f32.mrf.mxu0  ;;  %v7298_v59 = vpop.f32.mrf.mxu1 }
 0x19e   : > { %7614 = vst [vmem:[#allocation20_spill] sm:$0xff] %v7296_v58  ;;  %7615 = vst [vmem:[#allocation21_spill] sm:$0xff] %v7298_v59 }
 0x19f   : > { %v7300_v60 = vpop.f32.mrf.mxu0  ;;  %v7302_v61 = vpop.f32.mrf.mxu1 }
 0x1a0   : > { %7616 = vst [vmem:[#allocation22_spill] sm:$0xff] %v7300_v60  ;;  %7617 = vst [vmem:[#allocation23_spill] sm:$0xff] %v7302_v61 }
 0x1a3   : > { %v7304_v62 = vpop.f32.mrf.mxu0  ;;  %v7306_v63 = vpop.f32.mrf.mxu1 }
 0x1a5   : > { %v7308_v3 = vpop.f32.mrf.mxu0  ;;  %v7310_v4 = vpop.f32.mrf.mxu1 }
 0x1a9   : > { %v7312_v6 = vpop.f32.mrf.mxu0  ;;  %v7314_v7 = vpop.f32.mrf.mxu1 }
 0x1aa   : > { %7618 = vst [vmem:[#allocation24_spill] sm:$0xff] %v7312_v6  ;;  %7619 = vst [vmem:[#allocation25_spill] sm:$0xff] %v7314_v7 }
 0x1ab   : > { %v7316_v10 = vpop.f32.mrf.mxu0  ;;  %v7318_v11 = vpop.f32.mrf.mxu1 }
 0x1ac   : > { %7620 = vst [vmem:[#allocation26_spill] sm:$0xff] %v7316_v10  ;;  %7621 = vst [vmem:[#allocation27_spill] sm:$0xff] %v7318_v11  ;;  %v7366_v11 = vld [vmem:[#allocation8 + $0x8] sm:$0xff] }
 0x1af   : > { %v7320_v14 = vpop.f32.mrf.mxu0  ;;  %v7322_v15 = vpop.f32.mrf.mxu1 }
 0x1b0   : > { %7622 = vst [vmem:[#allocation28_spill] sm:$0xff] %v7320_v14  ;;  %7623 = vst [vmem:[#allocation29_spill] sm:$0xff] %v7322_v15  ;;  %v6161_v15 = vlaneseq }
 0x1b1   : > { %v7324_v18 = vpop.f32.mrf.mxu0  ;;  %v7326_v19 = vpop.f32.mrf.mxu1 }
 0x1b2   : > { %7624 = vst [vmem:[#allocation30_spill] sm:$0xff] %v7324_v18  ;;  %7625 = vst [vmem:[#allocation31_spill] sm:$0xff] %v7326_v19 }
 0x1b5   : > { %v7328_v22 = vpop.f32.mrf.mxu0  ;;  %v7330_v23 = vpop.f32.mrf.mxu1 }
 0x1b6   : > { %7626 = vst [vmem:[#allocation32_spill] sm:$0xff] %v7328_v22  ;;  %7627 = vst [vmem:[#allocation33_spill] sm:$0xff] %v7330_v23  ;;  %v7348_v22 = vshrl.u32 %v6161_v15, 7 }
 0x1b7   : > { %v7332_v26 = vpop.f32.mrf.mxu0  ;;  %v7334_v27 = vpop.f32.mrf.mxu1 }
 0x1b8   : > { %7628 = vst [vmem:[#allocation34_spill] sm:$0xff] %v7332_v26  ;;  %7629 = vst [vmem:[#allocation35_spill] sm:$0xff] %v7334_v27  ;;  %v6163_v27 = vsub.s32 0, %v7348_v22  ;;  %v6171_v14 = vsub.s32 2, %v7348_v22  ;;  %v6167_v56 = vsub.s32 1, %v7348_v22  ;;  %v6175_v55 = vsub.s32 3, %v7348_v22 }
 0x1b9   : > { %v6179_v54 = vsub.s32 4, %v7348_v22 }
 0x1ba   : > { %v6164_v6 = vrot.slane %v6157_v57, %v6163_v27  ;;  %v6172_v53 = vrot.slane %v6157_v57, %v6171_v14  ;;  %v7372_v52 = vrot.slane %v6157_v57, %v6167_v56 }
 0x1bb   : > { %v7336_v61 = vpop.f32.mrf.mxu0  ;;  %v7338_v60 = vpop.f32.mrf.mxu1 }
 0x1bd   : > { %v7340_v59 = vpop.f32.mrf.mxu0  ;;  %v7342_v58 = vpop.f32.mrf.mxu1 }
 0x1be   : > { %7630 = vst [vmem:[#allocation36_spill] sm:$0xff] %v7340_v59  ;;  %7631 = vst [vmem:[#allocation37_spill] sm:$0xff] %v7342_v58  ;;  %v7374_v58 = vrot.slane %v6157_v57, %v6175_v55  ;;  %v7376_v59 = vrot.slane %v6157_v57, %v6179_v54 }
 0x1c0   : > { %7640 = vst [vmem:[#allocation46_spill] sm:$0xff] %v7374_v58  ;;  %7641 = vst [vmem:[#allocation47_spill] sm:$0xff] %v7376_v59  ;;  %v3489_v58 = vadd.f32 %v7240_v30, %v7208_v1  ;;  %v7399_v59 = vrot.slane %v7366_v11, %v6167_v56  ;;  %v7413_v1 = vrot.slane %v7366_v11, %v6179_v54 }
 0x1c1   : > { %v7344_v18 = vpop.f32.mrf.mxu0  ;;  %v7346_v19 = vpop.f32.mrf.mxu1  ;;  %v3493_v30 = vadd.f32 %v7248_v34, %v7216_v8  ;;  %v3497_v54 = vadd.f32 %v7256_v38, %v7224_v16  ;;  %v3500_v16 = vadd.f32 %v7262_v41, %v7230_v21  ;;  %v7462_v21 = vadd.f32 %v7270_v45, %v7238_v29  ;;  %v7649_v45 = vld [vmem:[#allocation25_spill] sm:$0xff] }
 0x1c2   : > { %7632 = vst [vmem:[#allocation38_spill] sm:$0xff] %v7344_v18  ;;  %7633 = vst [vmem:[#allocation39_spill] sm:$0xff] %v7346_v19  ;;  %v6187_v18 = vsub.s32 6, %v7348_v22 }
 0x1c3   : > { %v7350_v23 = vpop.f32.mrf.mxu0  ;;  %v7352_v26 = vpop.f32.mrf.mxu1 }
 0x1c4   : > { %7634 = vst [vmem:[#allocation40_spill] sm:$0xff] %v7350_v23  ;;  %7635 = vst [vmem:[#allocation41_spill] sm:$0xff] %v7352_v26  ;;  %v7596_v23 = vsub.s32 5, %v7348_v22  ;;  %v7597_v26 = vsub.s32 7, %v7348_v22 }
 0x1c6   : > { %v7386_v51 = vrot.slane %v6157_v57, %v7597_v26 }
 0x1c7   : > { %v7360_v19 = vpop.f32.mrf.mxu0  ;;  %v7362_v15 = vpop.f32.mrf.mxu1 }
 0x1c8   : > { %7636 = vst [vmem:[#allocation42_spill] sm:$0xff] %v7360_v19  ;;  %7637 = vst [vmem:[#allocation43_spill] sm:$0xff] %v7362_v15  ;;  %v7378_v19 = vrot.slane %v6157_v57, %v6187_v18  ;;  %v7382_v15 = vrot.slane %v6157_v57, %v7596_v23  ;;  %v7402_v23 = vrot.slane %v7366_v11, %v6175_v55 }
 0x1c9   : > { %v7368_v10 = vpop.f32.mrf.mxu0  ;;  %v7370_v7 = vpop.f32.mrf.mxu1  ;;  %v3490_v57 = vadd.f32 %v7244_v32, %v7212_v0  ;;  %v4144_v0 = vadd.f32 %v7272_v46, %v3489_v58  ;;  %v3494_v32 = vadd.f32 %v7252_v36, %v7220_v12  ;;  %v3499_v55 = vadd.f32 %v7258_v39, %v7226_v17 }
 0x1ca   : > { %7638 = vst [vmem:[#allocation44_spill] sm:$0xff] %v7368_v10  ;;  %7639 = vst [vmem:[#allocation45_spill] sm:$0xff] %v7370_v7  ;;  %v7389_v7 = vrot.slane %v7366_v11, %v6163_v27  ;;  %v7392_v10 = vrot.slane %v7366_v11, %v6171_v14  ;;  %v3492_v27 = vadd.f32 %v7246_v33, %v7214_v5 }
 0x1cb   : > { %7642 = vst [vmem:[#allocation48_spill] sm:$0xff] %v7378_v19  ;;  %v3491_v19 = vadd.f32 %v7242_v31, %v7210_v2  ;;  %v7416_v2 = vrot.slane %v7366_v11, %v6187_v18  ;;  %v3495_v31 = vadd.f32 %v7250_v35, %v7218_v9  ;;  %v3496_v33 = vadd.f32 %v7254_v37, %v7222_v13 }
 0x1cc   : > { %v4145_v9 = vadd.f32 %v7276_v48, %v3490_v57  ;;  %v4147_v35 = vadd.f32 %v7278_v49, %v3492_v27  ;;  %v4799_v46 = vadd.f32 %v7304_v62, %v4144_v0  ;;  %v3498_v13 = vadd.f32 %v7260_v40, %v7228_v20  ;;  %v7645_v49 = vld [vmem:[#allocation37_spill] sm:$0xff]  ;;  %v7651_v0 = vld [vmem:[#allocation27_spill] sm:$0xff] }
 0x1cd   : > { %v7408_v14 = vpop.f32.mrf.mxu0  ;;  %v7410_v26 = vpop.f32.mrf.mxu1  ;;  %v4146_v5 = vadd.f32 %v7274_v47, %v3491_v19  ;;  %v7446_v17 = vadd.f32 %v7264_v42, %v7232_v24  ;;  %v7450_v36 = vadd.f32 %v7266_v43, %v7234_v25  ;;  %v7458_v40 = vadd.f32 %v7268_v44, %v7236_v28  ;;  %v7643_v25 = vld [vmem:[#allocation13_spill] sm:$0xff]  ;;  %v7644_v47 = vld [vmem:[#allocation36_spill] sm:$0xff]  ;;  %v7647_v44 = vld [vmem:[#allocation15_spill] sm:$0xff] }
 0x1ce   : > { %v4800_v37 = vadd.f32 %v7308_v3, %v4145_v9  ;;  %v4802_v38 = vadd.f32 %v7310_v4, %v4147_v35  ;;  %v5454_v39 = vadd.f32 %v7336_v61, %v4799_v46  ;;  %v4148_v24 = vadd.f32 %v7280_v50, %v3493_v30  ;;  %v7646_v61 = vld [vmem:[#allocation14_spill] sm:$0xff]  ;;  %v7653_v46 = vld [vmem:[#allocation39_spill] sm:$0xff] }
 0x1cf   : > { %v7432_v8 = vpop.f32.mrf.mxu0  ;;  %v7434_v34 = vpop.f32.mrf.mxu1  ;;  %v4801_v12 = vadd.f32 %v7306_v63, %v4146_v5  ;;  %v4150_v41 = vadd.f32 %v7643_v25, %v3495_v31  ;;  %v4149_v28 = vadd.f32 %v7646_v61, %v3494_v32  ;;  %v4151_v62 = vadd.f32 %v7647_v44, %v3496_v33  ;;  %v7648_v63 = vld [vmem:[#allocation24_spill] sm:$0xff]  ;;  %v7650_v30 = vld [vmem:[#allocation26_spill] sm:$0xff] }
 0x1d0   : > { %v5455_v48 = vadd.f32 %v7644_v47, %v4800_v37  ;;  %v5457_v56 = vadd.f32 %v7645_v49, %v4802_v38  ;;  %v4803_v29 = vadd.f32 %v7648_v63, %v4148_v24  ;;  %v7652_v9 = vld [vmem:[#allocation38_spill] sm:$0xff]  ;;  %v7657_v25 = vld [vmem:[#allocation40_spill] sm:$0xff] }
 0x1d1   : > { %v5456_v20 = vadd.f32 %v7338_v60, %v4801_v12  ;;  %v4805_v3 = vadd.f32 %v7649_v45, %v4150_v41  ;;  %v4804_v31 = vadd.f32 %v7650_v30, %v4149_v28  ;;  %v4806_v5 = vadd.f32 %v7651_v0, %v4151_v62  ;;  %v7654_v38 = vld [vmem:[#allocation46_spill] sm:$0xff]  ;;  %v7661_v28 = vld [vmem:[#allocation28_spill] sm:$0xff]  ;;  %v7662_v62 = vld [vmem:[#allocation29_spill] sm:$0xff] }
 0x1d2   : > { %v5458_v35 = vadd.f32 %v7652_v9, %v4803_v29  ;;  %v7666_v30 = vld [vmem:[#allocation31_spill] sm:$0xff] }
 0x1d3   : > { %v5607_v42 = vpop.f32.mrf.mxu0  ;;  %v5678_v43 = vpop.f32.mrf.mxu1  ;;  %v5460_v32 = vadd.f32 %v7653_v46, %v4805_v3  ;;  %v5459_v41 = vadd.f32 %v7657_v25, %v4804_v31  ;;  %v7663_v3 = vld [vmem:[#allocation47_spill] sm:$0xff]  ;;  %v7667_v31 = vld [vmem:[#allocation42_spill] sm:$0xff] }
 0x1d4   : > { %v6109_v58 = vadd.f32 %v5607_v42, %v5454_v39  ;;  %v6111_v60 = vadd.f32 %v5678_v43, %v5456_v20  ;;  %v7655_v20 = vld [vmem:[#allocation16_spill] sm:$0xff]  ;;  %v7658_v42 = vld [vmem:[#allocation41_spill] sm:$0xff] }
 0x1d5   : > { %v5609_v50 = vpop.f32.mrf.mxu0  ;;  %v5680_v4 = vpop.f32.mrf.mxu1  ;;  %v4152_v24 = vadd.f32 %v7655_v20, %v3497_v54  ;;  %v5461_v43 = vadd.f32 %v7658_v42, %v4806_v5  ;;  %v7668_v5 = vld [vmem:[#allocation43_spill] sm:$0xff]  ;;  %v7671_v20 = vld [vmem:[#allocation44_spill] sm:$0xff] }
 0x1d6   : > { %v6241_v18 = vadd.f32 %v6164_v6, %v6109_v58  ;;  %v6243_v19 = vadd.f32 %v6172_v53, %v6111_v60  ;;  %v6110_v57 = vadd.f32 %v5609_v50, %v5455_v48  ;;  %v6112_v27 = vadd.f32 %v5680_v4, %v5457_v56  ;;  %v7656_v6 = vld [vmem:[#allocation17_spill] sm:$0xff]  ;;  %v7659_v58 = vld [vmem:[#allocation18_spill] sm:$0xff]  ;;  %v7660_v60 = vld [vmem:[#allocation19_spill] sm:$0xff] }
 0x1d7   : > { %v4154_v53 = vadd.f32 %v7656_v6, %v3499_v55  ;;  %v4153_v55 = vadd.f32 %v7659_v58, %v3498_v13  ;;  %v4155_v61 = vadd.f32 %v7660_v60, %v3500_v16  ;;  %v4807_v44 = vadd.f32 %v7661_v28, %v4152_v24  ;;  %v7664_v4 = vld [vmem:[#allocation48_spill] sm:$0xff]  ;;  %v7672_v6 = vld [vmem:[#allocation45_spill] sm:$0xff] }
 0x1d8   : > { %v6257_v12 = vmax.f32 %v6241_v18, 0.0  ;;  %v6259_v33 = vmax.f32 %v6243_v19, 0.0  ;;  %v6242_v37 = vadd.f32 %v7372_v52, %v6110_v57  ;;  %v6244_v39 = vadd.f32 %v7654_v38, %v6112_v27  ;;  %v7665_v27 = vld [vmem:[#allocation30_spill] sm:$0xff]  ;;  %v7670_v38 = vld [vmem:[#allocation21_spill] sm:$0xff] }
 0x1d9   : > { %v5749_v47 = vpop.f32.mrf.mxu0  ;;  %v5820_v48 = vpop.f32.mrf.mxu1  ;;  %v4809_v63 = vadd.f32 %v7662_v62, %v4154_v53  ;;  %v4808_v13 = vadd.f32 %v7665_v27, %v4153_v55  ;;  %v4810_v16 = vadd.f32 %v7666_v30, %v4155_v61  ;;  %v5462_v0 = vadd.f32 %v7667_v31, %v4807_v44  ;;  %v7677_v62 = vld [vmem:[#allocation34_spill] sm:$0xff] }
 0x1da   : > { %6273 = vst [vmem:[%s7483_s22] sm:$0xff] %v6257_v12  ;;  %6275 = vst [vmem:[%s7483_s22 + $0x10] sm:$0xff] %v6259_v33  ;;  %v6258_v52 = vmax.f32 %v6242_v37, 0.0  ;;  %v6260_v49 = vmax.f32 %v6244_v39, 0.0  ;;  %v6113_v56 = vadd.f32 %v5749_v47, %v5458_v35  ;;  %v6115_v54 = vadd.f32 %v5820_v48, %v5460_v32  ;;  %v7669_v33 = vld [vmem:[#allocation20_spill] sm:$0xff]  ;;  %v7673_v47 = vld [vmem:[#allocation22_spill] sm:$0xff] }
 0x1db   : > { %v5751_v29 = vpop.f32.mrf.mxu0  ;;  %v5822_v45 = vpop.f32.mrf.mxu1  ;;  %v5464_v9 = vadd.f32 %v7668_v5, %v4809_v63  ;;  %v4156_v37 = vadd.f32 %v7669_v33, %v7446_v17  ;;  %v4158_v39 = vadd.f32 %v7670_v38, %v7450_v36  ;;  %v5463_v24 = vadd.f32 %v7671_v20, %v4808_v13  ;;  %v7674_v48 = vld [vmem:[#allocation23_spill] sm:$0xff] }
 0x1dc   : > { %6274 = vst [vmem:[%s7483_s22 + $0x8] sm:$0xff] %v6258_v52  ;;  %6276 = vst [vmem:[%s7483_s22 + $0x18] sm:$0xff] %v6260_v49  ;;  %v6245_v50 = vadd.f32 %v7663_v3, %v6113_v56  ;;  %v6247_v18 = vadd.f32 %v7664_v4, %v6115_v54  ;;  %v6114_v19 = vadd.f32 %v5751_v29, %v5459_v41  ;;  %v7675_v52 = vld [vmem:[#allocation32_spill] sm:$0xff]  ;;  %v7676_v56 = vld [vmem:[#allocation33_spill] sm:$0xff]  ;;  %v7679_v27 = vsub.s32 5, %v7348_v22 }
 0x1dd   : > { %v6116_v57 = vadd.f32 %v5822_v45, %v5461_v43  ;;  %v5465_v53 = vadd.f32 %v7672_v6, %v4810_v16  ;;  %v4157_v17 = vadd.f32 %v7673_v47, %v7458_v40  ;;  %v4159_v36 = vadd.f32 %v7674_v48, %v7462_v21  ;;  %v7678_v63 = vld [vmem:[#allocation35_spill] sm:$0xff] }
 0x1de   : > { %v6261_v35 = vmax.f32 %v6245_v50, 0.0  ;;  %v6263_v46 = vmax.f32 %v6247_v18, 0.0  ;;  %v6246_v32 = vadd.f32 %v7382_v15, %v6114_v19  ;;  %v4811_v49 = vadd.f32 %v7675_v52, %v4156_v37 }
 0x1df   : > { %v6248_v12 = vadd.f32 %v7386_v51, %v6116_v57  ;;  %v5891_v25 = vpop.f32.mrf.mxu0  ;;  %v5962_v41 = vpop.f32.mrf.mxu1  ;;  %v4813_v54 = vadd.f32 %v7676_v56, %v4158_v39  ;;  %v4812_v40 = vadd.f32 %v7677_v62, %v4157_v17  ;;  %v4814_v21 = vadd.f32 %v7678_v63, %v4159_v36 }
 0x1e0   : > { %6277 = vst [vmem:[%s7483_s22 + $0x20] sm:$0xff] %v6261_v35  ;;  %6279 = vst [vmem:[%s7483_s22 + $0x30] sm:$0xff] %v6263_v46  ;;  %v6262_v42 = vmax.f32 %v6246_v32, 0.0  ;;  %v6117_v43 = vadd.f32 %v5891_v25, %v5462_v0  ;;  %v6119_v51 = vadd.f32 %v5962_v41, %v5464_v9  ;;  %v5466_v29 = vadd.f32 %v7408_v14, %v4811_v49 }
 0x1e1   : > { %v6264_v15 = vmax.f32 %v6248_v12, 0.0  ;;  %v5893_v58 = vpop.f32.mrf.mxu0  ;;  %v5964_v55 = vpop.f32.mrf.mxu1  ;;  %v5468_v45 = vadd.f32 %v7410_v26, %v4813_v54  ;;  %v5469_v18 = vadd.f32 %v7434_v34, %v4814_v21  ;;  %v6216_v14 = vrot.slane %v7366_v11, %v7679_v27 }
 0x1e2   : > { %6278 = vst [vmem:[%s7483_s22 + $0x28] sm:$0xff] %v6262_v42  ;;  %v6249_v60 = vadd.f32 %v7389_v7, %v6117_v43  ;;  %v6251_v61 = vadd.f32 %v7392_v10, %v6119_v51  ;;  %v6118_v28 = vadd.f32 %v5893_v58, %v5463_v24  ;;  %v6120_v44 = vadd.f32 %v5964_v55, %v5465_v53 }
 0x1e3   : > { %6280 = vst [vmem:[%s7483_s22 + $0x38] sm:$0xff] %v6264_v15  ;;  %v5467_v10 = vadd.f32 %v7432_v8, %v4812_v40  ;;  %v7680_v26 = vsub.s32 7, %v7348_v22 }
 0x1e4   : > { %v6265_v3 = vmax.f32 %v6249_v60, 0.0  ;;  %v6267_v50 = vmax.f32 %v6251_v61, 0.0  ;;  %v6250_v4 = vadd.f32 %v7399_v59, %v6118_v28  ;;  %v6252_v7 = vadd.f32 %v7402_v23, %v6120_v44 }
 0x1e5   : > { %v6033_v19 = vpop.f32.mrf.mxu0  ;;  %v6104_v57 = vpop.f32.mrf.mxu1  ;;  %v6224_v13 = vrot.slane %v7366_v11, %v7680_v26 }
 0x1e6   : > { %6281 = vst [vmem:[%s7483_s22 + $0x40] sm:$0xff] %v6265_v3  ;;  %6283 = vst [vmem:[%s7483_s22 + $0x50] sm:$0xff] %v6267_v50  ;;  %v6266_v59 = vmax.f32 %v6250_v4, 0.0  ;;  %v6268_v23 = vmax.f32 %v6252_v7, 0.0  ;;  %v6121_v30 = vadd.f32 %v6033_v19, %v5466_v29  ;;  %v6123_v8 = vadd.f32 %v6104_v57, %v5468_v45 }
 0x1e7   : > { %v6035_v34 = vpop.f32.mrf.mxu0  ;;  %v6106_v16 = vpop.f32.mrf.mxu1 }
 0x1e8   : > { %6282 = vst [vmem:[%s7483_s22 + $0x48] sm:$0xff] %v6266_v59  ;;  %6284 = vst [vmem:[%s7483_s22 + $0x58] sm:$0xff] %v6268_v23  ;;  %v6253_v31 = vadd.f32 %v7413_v1, %v6121_v30  ;;  %v6255_v22 = vadd.f32 %v7416_v2, %v6123_v8  ;;  %v6122_v11 = vadd.f32 %v6035_v34, %v5467_v10 }
 0x1e9   : > { %v6124_v0 = vadd.f32 %v6106_v16, %v5469_v18 }
 0x1ea   : > { %v6269_v5 = vmax.f32 %v6253_v31, 0.0  ;;  %v6271_v9 = vmax.f32 %v6255_v22, 0.0  ;;  %v6254_v35 = vadd.f32 %v6216_v14, %v6122_v11 }
 0x1eb   : > { %v6256_v46 = vadd.f32 %v6224_v13, %v6124_v0 }
 0x1ec   : > { %6285 = vst [vmem:[%s7483_s22 + $0x60] sm:$0xff] %v6269_v5  ;;  %6287 = vst [vmem:[%s7483_s22 + $0x70] sm:$0xff] %v6271_v9  ;;  %v6270_v32 = vmax.f32 %v6254_v35, 0.0 }
 0x1ed   : > { %v6272_v12 = vmax.f32 %v6256_v46, 0.0 }
 0x1ee   : > { %6286 = vst [vmem:[%s7483_s22 + $0x68] sm:$0xff] %v6270_v32 }
 0x1ef   : > { %6288 = vst [vmem:[%s7483_s22 + $0x78] sm:$0xff] %v6272_v12 }
 0x1f0   : > { %6713 = shalt.err (!%p6710_p10)
}
 0x1f1   : > { %s6714_s28 = scalar_lea.hbm %s7546_s21, 2048  ;;  %s6718_s30 = scalar_lea.hbm %s7593_s3, 4096 }
 0x1f2   : > { %p6715_p3 = scmp.ne.s32.totalorder %s7546_s21, %s6714_s28  ;;  %p6719_p12 = scmp.lt.s32.totalorder %s7546_s21, %s7593_s3 }
 0x1f3   : > { %p6720_p7 = scmp.lt.s32.totalorder %s6718_s30, %s6714_s28 }
 0x1f4   : > { %p6716_p1 = pnand %p6715_p3, %p6910_p13 }
 0x1f5   : > { %p6721_p9 = por %p6720_p7, %p6719_p12 }
 0x1f6   : > { %p6717_p6 = pneg %p6716_p1 }
 0x1f8   : > { %p6722_p4 = pnand %p6721_p9, %p6717_p6 }
 0x1fa   : > { %6725 = shalt.err (!%p6722_p4)
}
 0x1fb   : > { %6543 = dma.vmem_to_hbm [thread:$0]  (%p6910_p13), %s6307_s5, 2048, %s7546_s21, %s6290_s9  }
 0x1fc PF: > { %s6318_s20 = sand.u32 1, %s6764_s12   ;;  %p7681_p8 = scmp.ne.s32.totalorder %s7601_s23, 0 }
 0x1fd   : > { %p7682_p0 = scmp.ge.s32.totalorder %s6784_s17, 2  ;;  %s6319_s22 = scalar_lea.sflag [#allocation5], %s6318_s20 }
 0x1ff   : > { %p6557_p11 = pnand %p7682_p0, %p7681_p8 }
 0x201   : > { %p6558_p2 = pneg %p6557_p11 }
 0x203   : > { %6759 = dma.done.wait (%p6558_p2), %s6319_s22, 2048  }
 0x204   : > { %6761 = vsyncadd (%p6558_p2), %s6319_s22, 4294965248  ;;  %s20_s17 = sadd.s32 1, %s6784_s17   ;;  %s7683_s12 = smov %s6768_s13 }
 0x205   : > { %p17_p5 = scmp.ge.s32.totalorder %s20_s17, 4   ;;  %s7684_s13 = smov %s6772_s14 }
 0x206   : > { %s7685_s14 = smov %s6919_s29  ;;  %s7686_s15 = smov %s6780_s16 }
 0x207   : > { %s7687_s16 = smov %s7689_s11  ;;  %19 = sbr.rel (!%p17_p5) target bundleno = 7 (0x7), region = 102 }
 0x20c   :  { %6324 = vsyncpa [#allocation4], 1 }
 0x20d   :  { %6326 = vsyncpa [#allocation4 + $0x1], 1 }
 0x20e   :  { %6327 = vsyncpa [#allocation7], 1 }
 0x20f   :  { %6328 = vsyncpa [#allocation5], 1 }
 0x210   :  { %6330 = vsyncpa [#allocation5 + $0x1], 1 }

</bundles_post_ra>
